<compile_context>
chip_gen: v7x
topology: tpu7x:2x2x1
jax: 0.10.0
libtpu: 0.0.40
codegen_flags: <defaults>
</compile_context>

<pallas_src>
import numpy as np
import jax
import jax.numpy as jnp
from jax.experimental import pallas as pl
from jax.experimental.pallas import tpu as pltpu

NC_PAD = 128  # FC output lanes padded to a full vreg lane width


# ----------------------------------------------------------------------------
# Fused kernel: one batch tile (B_TILE images) per grid step, everything
# resident in VMEM/vregs.
# ----------------------------------------------------------------------------
def _convnet_fused_kernel(x_ref, d1_ref, d2_ref,
                          w1_ref, so1_ref, w2_ref, so2_ref, w3_ref, so3_ref,
                          re_ref, se_ref, wr_ref, dm_ref, sel_ref, ff_ref,
                          bfc_ref, o_ref):
    f32 = jnp.float32
    bf16 = jnp.bfloat16

    def conv3x3(xb, d_ref, wb_ref, so_ref):
        # xb: (M, W*Cin) bf16 lane-dense batched activation rows.
        # d_ref[0]: (M, M) row-shift "x[r-1]" matrix, zeroed at the first row
        #   of every image; d_ref[1]: "x[r+1]", zeroed at the last row.
        # wb_ref[kh]: (W*Cin, W*Cout) banded weight (W padding folded in).
        x_m1 = jnp.dot(d_ref[0], xb, preferred_element_type=f32).astype(bf16)
        x_p1 = jnp.dot(d_ref[1], xb, preferred_element_type=f32).astype(bf16)
        acc = jnp.dot(x_m1, wb_ref[0], preferred_element_type=f32)
        acc = acc + jnp.dot(xb, wb_ref[1], preferred_element_type=f32)
        acc = acc + jnp.dot(x_p1, wb_ref[2], preferred_element_type=f32)
        # fused conv bias + folded eval-mode BatchNorm + ReLU (f32 epilogue)
        y = jnp.maximum(acc * so_ref[0:1, :] + so_ref[1:2, :], 0.0)
        return y.astype(bf16)

    xb = x_ref[...]                                             # (B*H, W*Cin)

    # conv1 + bn1 + relu1
    y1 = conv3x3(xb, d1_ref, w1_ref, so1_ref)                   # (B*H, W*C1)

    # 2x2 stride-2 max pool over the whole batch tile.  H is even, so global
    # even/odd row selection == within-image even/odd selection; the column
    # selection matrices fold the channel interleave (kron with eye(C1)).
    rmax = jnp.maximum(jnp.dot(re_ref[0], y1, preferred_element_type=f32),
                       jnp.dot(re_ref[1], y1, preferred_element_type=f32)
                       ).astype(bf16)                           # (B*Hh, W*C1)
    pooled = jnp.maximum(jnp.dot(rmax, se_ref[0], preferred_element_type=f32),
                         jnp.dot(rmax, se_ref[1], preferred_element_type=f32)
                         ).astype(bf16)                         # (B*Hh, Wh*C1)

    # conv2 + relu2 (no BN) and conv3 + bn3 + relu3
    y2 = conv3x3(pooled, d2_ref, w2_ref, so2_ref)               # (B*Hh, Wh*C2)
    y3 = conv3x3(y2, d2_ref, w3_ref, so3_ref)                   # (B*Hh, Wh*C3)

    # FC: torch NCHW flatten permutation is pre-baked into wr.
    #   t[r, h*K+k] = sum_{w,c} y3[r, w*C3+c] * Wfc[k, c*Hh*Wh + h*Wh + w]
    # keep only the (r % Hh == h) blocks, sum rows per image, fold the Hh
    # lane-groups down to NC_PAD lanes, add bias.
    t = jnp.dot(y3, wr_ref[...], preferred_element_type=f32)    # (B*Hh, Hh*K)
    t = t * dm_ref[...]
    s = jnp.dot(sel_ref[...], t, preferred_element_type=f32)    # (B, Hh*K)
    o = jnp.dot(s, ff_ref[...], preferred_element_type=f32)     # (B, NC_PAD)
    o_ref[...] = o + bfc_ref[...]


# ----------------------------------------------------------------------------
# Init-time constant construction (im2col/pool/flatten plumbing baked into
# weights outside the hot path).
# ----------------------------------------------------------------------------
def _band_conv_weight(cw, width):
    # cw: (3, 3, Cin, Cout) -> (3, width*Cin, width*Cout); W padding folded in.
    kh_n, kw_n, ci, co = cw.shape
    b = np.zeros((kh_n, width * ci, width * co), np.float32)
    for kh in range(kh_n):
        for kw in range(kw_n):
            for wc in range(width):              # output column
                wrow = wc + kw - 1               # input column touched by tap kw
                if 0 <= wrow < width:
                    b[kh, wrow * ci:(wrow + 1) * ci, wc * co:(wc + 1) * co] = cw[kh, kw]
    return b


def _shift_mats(n_rows, img_h):
    # Row-shift matrices at the batched size, zeroed at per-image boundaries.
    i = np.arange(n_rows)
    not_first = (i % img_h) != 0
    not_last = (i % img_h) != (img_h - 1)
    dn = ((i[:, None] == i[None, :] + 1) & not_first[:, None]).astype(np.float32)
    up = ((i[:, None] == i[None, :] - 1) & not_last[:, None]).astype(np.float32)
    return np.stack([dn, up])   # dn @ x -> x[r-1],  up @ x -> x[r+1]


def make_raw_params(key, num_classes=5, cin=3, c1=12, c2=20, c3=32, h=16, w=16):
    eps = 1e-5
    ks = iter(jax.random.split(key, 24))

    def conv_w(k, ci, co):
        return jax.random.normal(k, (3, 3, ci, co), jnp.float32) / np.sqrt(ci * 9)

    def bn(kg, kb, km, kv, c):
        gamma = 1.0 + 0.1 * jax.random.normal(kg, (c,), jnp.float32)
        beta = 0.1 * jax.random.normal(kb, (c,), jnp.float32)
        mean = 0.1 * jax.random.normal(km, (c,), jnp.float32)
        var = 1.0 + 0.1 * jax.random.uniform(kv, (c,), jnp.float32)
        return gamma, beta, mean, var

    raw = {"eps": eps, "h": h, "w": w}
    raw["w1"] = conv_w(next(ks), cin, c1)
    raw["b1"] = 0.01 * jax.random.normal(next(ks), (c1,), jnp.float32)
    raw["bn1"] = bn(next(ks), next(ks), next(ks), next(ks), c1)
    raw["w2"] = conv_w(next(ks), c1, c2)
    raw["b2"] = 0.01 * jax.random.normal(next(ks), (c2,), jnp.float32)
    raw["w3"] = conv_w(next(ks), c2, c3)
    raw["b3"] = 0.01 * jax.random.normal(next(ks), (c3,), jnp.float32)
    raw["bn3"] = bn(next(ks), next(ks), next(ks), next(ks), c3)
    feat = c3 * (h // 2) * (w // 2)        # module hard-codes 32*75*75 at 150x150
    raw["wfc"] = jax.random.normal(next(ks), (num_classes, feat), jnp.float32) / np.sqrt(feat)
    raw["bfc"] = 0.01 * jax.random.normal(next(ks), (num_classes,), jnp.float32)
    return raw


def build_kernel_params(raw, b_tile=8):
    # b_tile=8 -> M=128 rows (v5e native MXU tile); use 16 for 256 on v6e/v7x.
    h, w = raw["h"], raw["w"]
    hh, wh = h // 2, w // 2
    eps = raw["eps"]

    cw1 = np.asarray(raw["w1"]); cw2 = np.asarray(raw["w2"]); cw3 = np.asarray(raw["w3"])
    b1 = np.asarray(raw["b1"]); b2 = np.asarray(raw["b2"]); b3 = np.asarray(raw["b3"])
    g1, be1, m1_, v1 = (np.asarray(a) for a in raw["bn1"])
    g3, be3, m3_, v3 = (np.asarray(a) for a in raw["bn3"])
    wfc = np.asarray(raw["wfc"]); bfc = np.asarray(raw["bfc"])
    c1 = cw1.shape[3]; c2 = cw2.shape[3]; c3 = cw3.shape[3]
    ncls = bfc.shape[0]
    mrows1, mrows2 = b_tile * h, b_tile * hh

    # fold conv bias + eval-mode BN into per-channel scale / offset
    s1 = (g1 / np.sqrt(v1 + eps)).astype(np.float32)
    o1 = ((b1 - m1_) * s1 + be1).astype(np.float32)
    s3 = (g3 / np.sqrt(v3 + eps)).astype(np.float32)
    o3 = ((b3 - m3_) * s3 + be3).astype(np.float32)

    bfl = lambda a: jnp.asarray(np.asarray(a, np.float32), jnp.bfloat16)
    f32 = lambda a: jnp.asarray(np.asarray(a, np.float32), jnp.float32)

    kp = {}
    kp["d1"] = bfl(_shift_mats(mrows1, h))
    kp["d2"] = bfl(_shift_mats(mrows2, hh))

    kp["w1b"] = bfl(_band_conv_weight(cw1, w))
    kp["so1"] = f32(np.stack([np.tile(s1, w), np.tile(o1, w)]))
    kp["w2b"] = bfl(_band_conv_weight(cw2, wh))
    kp["so2"] = f32(np.stack([np.ones(wh * c2, np.float32), np.tile(b2, wh)]))
    kp["w3b"] = bfl(_band_conv_weight(cw3, wh))
    kp["so3"] = f32(np.stack([np.tile(s3, wh), np.tile(o3, wh)]))

    # maxpool: even/odd row selection at batched size + even/odd column groups
    re = np.zeros((2, mrows2, mrows1), np.float32)
    re[0, np.arange(mrows2), 2 * np.arange(mrows2)] = 1.0
    re[1, np.arange(mrows2), 2 * np.arange(mrows2) + 1] = 1.0
    kp["re"] = bfl(re)
    pe = np.zeros((w, wh), np.float32); pe[2 * np.arange(wh), np.arange(wh)] = 1.0
    po = np.zeros((w, wh), np.float32); po[2 * np.arange(wh) + 1, np.arange(wh)] = 1.0
    kp["se"] = bfl(np.stack([np.kron(pe, np.eye(c1, dtype=np.float32)),
                             np.kron(po, np.eye(c1, dtype=np.float32))]))

    # FC weight with the torch NCHW flatten permutation folded in:
    #   wr[w*C3 + c, h*K + k] = wfc[k, c*Hh*Wh + h*Wh + w]
    wr = wfc.reshape(ncls, c3, hh, wh).transpose(3, 1, 2, 0).reshape(wh * c3, hh * ncls)
    kp["wr"] = bfl(np.ascontiguousarray(wr))
    # block-diagonal keep-mask (row r keeps lane block r % Hh), per batch tile
    dm_img = np.kron(np.eye(hh, dtype=np.float32), np.ones((1, ncls), np.float32))
    kp["dm"] = f32(np.tile(dm_img, (b_tile, 1)))
    # per-image row-sum selector
    kp["sel"] = f32(np.kron(np.eye(b_tile, dtype=np.float32), np.ones((1, hh), np.float32)))
    # fold the Hh lane groups to NC_PAD lane-dense logits
    ff = np.zeros((hh * ncls, NC_PAD), np.float32)
    ff[:, :ncls] = np.tile(np.eye(ncls, dtype=np.float32), (hh, 1))
    kp["ff"] = f32(ff)
    bfp = np.zeros((1, NC_PAD), np.float32); bfp[0, :ncls] = bfc
    kp["bfc"] = f32(bfp)
    return kp


# ----------------------------------------------------------------------------
# Forward: one fused pallas_call, batch tiles on a "parallel" grid axis.
# ----------------------------------------------------------------------------
def convnet_forward(kp, x_nchw):
    n, cin, h, w = x_nchw.shape
    hh = h // 2
    b_tile = kp["sel"].shape[0]
    ncls = kp["dm"].shape[1] // hh
    nc_pad = kp["bfc"].shape[1]
    m1 = b_tile * h
    assert kp["d1"].shape[-1] == m1, "kernel params built for a different H / B_TILE"

    n_pad = pl.cdiv(n, b_tile) * b_tile
    # NCHW -> batched lane-dense rows (N*H, W*Cin), bf16; single fused XLA op.
    x_rows = jnp.transpose(x_nchw, (0, 2, 3, 1)).reshape(n * h, w * cin).astype(jnp.bfloat16)
    if n_pad != n:
        x_rows = jnp.pad(x_rows, ((0, (n_pad - n) * h), (0, 0)))

    consts = [kp["d1"], kp["d2"], kp["w1b"], kp["so1"], kp["w2b"], kp["so2"],
              kp["w3b"], kp["so3"], kp["re"], kp["se"], kp["wr"], kp["dm"],
              kp["sel"], kp["ff"], kp["bfc"]]

    def const_spec(a):
        zero = (0,) * a.ndim
        return pl.BlockSpec(a.shape, lambda i, _z=zero: _z)

    out = pl.pallas_call(
        _convnet_fused_kernel,
        out_shape=jax.ShapeDtypeStruct((n_pad, nc_pad), jnp.float32),
        grid=(n_pad // b_tile,),
        in_specs=[pl.BlockSpec((m1, w * cin), lambda i: (i, 0))]
                 + [const_spec(a) for a in consts],
        out_specs=pl.BlockSpec((b_tile, nc_pad), lambda i: (i, 0)),
        compiler_params=pltpu.CompilerParams(
            dimension_semantics=("parallel",)),   # shards batch tiles across TCs
    )(x_rows, *consts)
    return out[:n, :ncls]


# ----------------------------------------------------------------------------
# Pure-JAX per-layer reference.  mm_dtype=jnp.bfloat16 mirrors the kernel's
# MXU input precision (f32 accumulation), so the tolerance below checks the
# layout / folding / pooling / flatten plumbing tightly; pass jnp.float32 to
# reproduce the exact f32 module semantics instead (differences vs the bf16
# kernel are then ~1%, inherent to bf16 MXU inputs).
# ----------------------------------------------------------------------------
def reference_forward(raw, x_nchw, mm_dtype=jnp.bfloat16):
    eps = raw["eps"]
    f32 = jnp.float32

    def conv(x_nhwc, cw, b):
        n, hh, ww, _ = x_nhwc.shape
        xq = jnp.pad(x_nhwc.astype(mm_dtype), ((0, 0), (1, 1), (1, 1), (0, 0)))
        wq = jnp.asarray(cw).astype(mm_dtype)
        out = jnp.zeros((n, hh, ww, cw.shape[-1]), f32) + jnp.asarray(b, f32)
        for kh in range(3):
            for kw in range(3):
                out = out + jnp.einsum("nhwc,cd->nhwd",
                                       xq[:, kh:kh + hh, kw:kw + ww, :], wq[kh, kw],
                                       preferred_element_type=f32)
        return out

    def bn(x, p):
        g, be, m, v = (jnp.asarray(a, f32) for a in p)
        return (x - m) / jnp.sqrt(v + eps) * g + be

    x = jnp.transpose(x_nchw, (0, 2, 3, 1))
    y = jax.nn.relu(bn(conv(x, raw["w1"], raw["b1"]), raw["bn1"]))
    n, hh, ww, c = y.shape
    y = y.reshape(n, hh // 2, 2, ww // 2, 2, c).max(axis=(2, 4))
    y = jax.nn.relu(conv(y, raw["w2"], raw["b2"]))
    y = jax.nn.relu(bn(conv(y, raw["w3"], raw["b3"]), raw["bn3"]))
    y = jnp.transpose(y, (0, 3, 1, 2)).reshape(n, -1)          # torch view(-1, C*H*W)
    logits = jnp.einsum("nf,kf->nk", y.astype(mm_dtype),
                        jnp.asarray(raw["wfc"]).astype(mm_dtype),
                        preferred_element_type=f32)
    return logits + jnp.asarray(raw["bfc"], f32)


if __name__ == "__main__":
    key = jax.random.PRNGKey(0)
    kx, kparam = jax.random.split(key)
    N, CIN, H, W = 12, 3, 16, 16                 # N=12 exercises the batch-pad path
    x = jax.random.normal(kx, (N, CIN, H, W), jnp.float32)   # NCHW like PyTorch

    raw = make_raw_params(kparam, num_classes=5, cin=CIN, h=H, w=W)
    kp = build_kernel_params(raw, b_tile=8)      # M = 8*16 = 128 rows per tile

    fwd = jax.jit(convnet_forward)
    out = jax.block_until_ready(fwd(kp, x))
    assert out.shape == (N, 5), out.shape

    ref = jax.block_until_ready(reference_forward(raw, x))
    np.testing.assert_allclose(np.asarray(out), np.asarray(ref), rtol=2e-2, atol=2e-2)
    print("KERNEL_OK")
</pallas_src>

<mosaic_0001>
module attributes {stable_mosaic.version = 11 : i64} {
  func.func @_convnet_fused_kernel(%arg0: i32, %arg1: memref<128x48xbf16, #tpu.memory_space<vmem>>, %arg2: memref<2x128x128xbf16, #tpu.memory_space<vmem>>, %arg3: memref<2x64x64xbf16, #tpu.memory_space<vmem>>, %arg4: memref<3x48x192xbf16, #tpu.memory_space<vmem>>, %arg5: memref<2x192xf32, #tpu.memory_space<vmem>>, %arg6: memref<3x96x160xbf16, #tpu.memory_space<vmem>>, %arg7: memref<2x160xf32, #tpu.memory_space<vmem>>, %arg8: memref<3x160x256xbf16, #tpu.memory_space<vmem>>, %arg9: memref<2x256xf32, #tpu.memory_space<vmem>>, %arg10: memref<2x64x128xbf16, #tpu.memory_space<vmem>>, %arg11: memref<2x192x96xbf16, #tpu.memory_space<vmem>>, %arg12: memref<256x40xbf16, #tpu.memory_space<vmem>>, %arg13: memref<64x40xf32, #tpu.memory_space<vmem>>, %arg14: memref<8x64xf32, #tpu.memory_space<vmem>>, %arg15: memref<40x128xf32, #tpu.memory_space<vmem>>, %arg16: memref<1x128xf32, #tpu.memory_space<vmem>>, %arg17: memref<8x128xf32, #tpu.memory_space<vmem>>) attributes {dimension_semantics = [#tpu.dimension_semantics<parallel>], iteration_bounds = array<i64: 2>, scalar_prefetch = 0 : i64, scratch_operands = 0 : i64, tpu.core_type = #tpu.core_type<tc>, window_params = [{transform_indices = @transform_0, window_bounds = array<i64: 128, 48>}, {pipeline_mode = #tpu.pipeline_mode<synchronous>, transform_indices = @transform_1, window_bounds = array<i64: 2, 128, 128>}, {pipeline_mode = #tpu.pipeline_mode<synchronous>, transform_indices = @transform_2, window_bounds = array<i64: 2, 64, 64>}, {pipeline_mode = #tpu.pipeline_mode<synchronous>, transform_indices = @transform_3, window_bounds = array<i64: 3, 48, 192>}, {pipeline_mode = #tpu.pipeline_mode<synchronous>, transform_indices = @transform_4, window_bounds = array<i64: 2, 192>}, {pipeline_mode = #tpu.pipeline_mode<synchronous>, transform_indices = @transform_5, window_bounds = array<i64: 3, 96, 160>}, {pipeline_mode = #tpu.pipeline_mode<synchronous>, transform_indices = @transform_6, window_bounds = array<i64: 2, 160>}, {pipeline_mode = #tpu.pipeline_mode<synchronous>, transform_indices = @transform_7, window_bounds = array<i64: 3, 160, 256>}, {pipeline_mode = #tpu.pipeline_mode<synchronous>, transform_indices = @transform_8, window_bounds = array<i64: 2, 256>}, {pipeline_mode = #tpu.pipeline_mode<synchronous>, transform_indices = @transform_9, window_bounds = array<i64: 2, 64, 128>}, {pipeline_mode = #tpu.pipeline_mode<synchronous>, transform_indices = @transform_10, window_bounds = array<i64: 2, 192, 96>}, {pipeline_mode = #tpu.pipeline_mode<synchronous>, transform_indices = @transform_11, window_bounds = array<i64: 256, 40>}, {pipeline_mode = #tpu.pipeline_mode<synchronous>, transform_indices = @transform_12, window_bounds = array<i64: 64, 40>}, {pipeline_mode = #tpu.pipeline_mode<synchronous>, transform_indices = @transform_13, window_bounds = array<i64: 8, 64>}, {pipeline_mode = #tpu.pipeline_mode<synchronous>, transform_indices = @transform_14, window_bounds = array<i64: 40, 128>}, {pipeline_mode = #tpu.pipeline_mode<synchronous>, transform_indices = @transform_15, window_bounds = array<i64: 1, 128>}, {transform_indices = @transform_16, window_bounds = array<i64: 8, 128>}]} {
    %c0 = arith.constant 0 : index
    %c0_0 = arith.constant 0 : index
    %0 = vector.load %arg1[%c0, %c0_0] : memref<128x48xbf16, #tpu.memory_space<vmem>>, vector<128x48xbf16>
    %c0_1 = arith.constant 0 : index
    %c0_2 = arith.constant 0 : index
    %c0_3 = arith.constant 0 : index
    %1 = vector.load %arg2[%c0_1, %c0_2, %c0_3] : memref<2x128x128xbf16, #tpu.memory_space<vmem>>, vector<1x128x128xbf16>
    %2 = vector.shape_cast %1 : vector<1x128x128xbf16> to vector<128x128xbf16>
    %cst = arith.constant dense<0.000000e+00> : vector<128x48xf32>
    %3 = tpu.matmul %2, %0, %cst {dimension_numbers = #tpu.dot_dimension_numbers<[1], [0], [0], [1], [0, 0, 1, 1], [], []>} : vector<128x128xbf16>, vector<128x48xbf16>, vector<128x48xf32> -> vector<128x48xf32>
    %4 = arith.truncf %3 : vector<128x48xf32> to vector<128x48xbf16>
    %c1 = arith.constant 1 : index
    %c0_4 = arith.constant 0 : index
    %c0_5 = arith.constant 0 : index
    %5 = vector.load %arg2[%c1, %c0_4, %c0_5] : memref<2x128x128xbf16, #tpu.memory_space<vmem>>, vector<1x128x128xbf16>
    %6 = vector.shape_cast %5 : vector<1x128x128xbf16> to vector<128x128xbf16>
    %cst_6 = arith.constant dense<0.000000e+00> : vector<128x48xf32>
    %7 = tpu.matmul %6, %0, %cst_6 {dimension_numbers = #tpu.dot_dimension_numbers<[1], [0], [0], [1], [0, 0, 1, 1], [], []>} : vector<128x128xbf16>, vector<128x48xbf16>, vector<128x48xf32> -> vector<128x48xf32>
    %8 = arith.truncf %7 : vector<128x48xf32> to vector<128x48xbf16>
    %c0_7 = arith.constant 0 : index
    %c0_8 = arith.constant 0 : index
    %c0_9 = arith.constant 0 : index
    %9 = vector.load %arg4[%c0_7, %c0_8, %c0_9] : memref<3x48x192xbf16, #tpu.memory_space<vmem>>, vector<1x48x192xbf16>
    %10 = vector.shape_cast %9 : vector<1x48x192xbf16> to vector<48x192xbf16>
    %cst_10 = arith.constant dense<0.000000e+00> : vector<128x192xf32>
    %11 = tpu.matmul %4, %10, %cst_10 {dimension_numbers = #tpu.dot_dimension_numbers<[1], [0], [0], [1], [0, 0, 1, 1], [], []>} : vector<128x48xbf16>, vector<48x192xbf16>, vector<128x192xf32> -> vector<128x192xf32>
    %c1_11 = arith.constant 1 : index
    %c0_12 = arith.constant 0 : index
    %c0_13 = arith.constant 0 : index
    %12 = vector.load %arg4[%c1_11, %c0_12, %c0_13] : memref<3x48x192xbf16, #tpu.memory_space<vmem>>, vector<1x48x192xbf16>
    %13 = vector.shape_cast %12 : vector<1x48x192xbf16> to vector<48x192xbf16>
    %cst_14 = arith.constant dense<0.000000e+00> : vector<128x192xf32>
    %14 = tpu.matmul %0, %13, %cst_14 {dimension_numbers = #tpu.dot_dimension_numbers<[1], [0], [0], [1], [0, 0, 1, 1], [], []>} : vector<128x48xbf16>, vector<48x192xbf16>, vector<128x192xf32> -> vector<128x192xf32>
    %15 = arith.addf %11, %14 : vector<128x192xf32>
    %c2 = arith.constant 2 : index
    %c0_15 = arith.constant 0 : index
    %c0_16 = arith.constant 0 : index
    %16 = vector.load %arg4[%c2, %c0_15, %c0_16] : memref<3x48x192xbf16, #tpu.memory_space<vmem>>, vector<1x48x192xbf16>
    %17 = vector.shape_cast %16 : vector<1x48x192xbf16> to vector<48x192xbf16>
    %cst_17 = arith.constant dense<0.000000e+00> : vector<128x192xf32>
    %18 = tpu.matmul %8, %17, %cst_17 {dimension_numbers = #tpu.dot_dimension_numbers<[1], [0], [0], [1], [0, 0, 1, 1], [], []>} : vector<128x48xbf16>, vector<48x192xbf16>, vector<128x192xf32> -> vector<128x192xf32>
    %19 = arith.addf %15, %18 : vector<128x192xf32>
    %c0_18 = arith.constant 0 : index
    %c0_19 = arith.constant 0 : index
    %20 = vector.load %arg5[%c0_18, %c0_19] : memref<2x192xf32, #tpu.memory_space<vmem>>, vector<1x192xf32>
    %21 = vector.broadcast %20 : vector<1x192xf32> to vector<128x192xf32>
    %22 = arith.mulf %19, %21 : vector<128x192xf32>
    %c1_20 = arith.constant 1 : index
    %c0_21 = arith.constant 0 : index
    %23 = vector.load %arg5[%c1_20, %c0_21] : memref<2x192xf32, #tpu.memory_space<vmem>>, vector<1x192xf32>
    %24 = vector.broadcast %23 : vector<1x192xf32> to vector<128x192xf32>
    %25 = arith.addf %22, %24 : vector<128x192xf32>
    %cst_22 = arith.constant 0.000000e+00 : f32
    %26 = vector.broadcast %cst_22 : f32 to vector<128x192xf32>
    %27 = arith.maximumf %25, %26 : vector<128x192xf32>
    %28 = arith.truncf %27 : vector<128x192xf32> to vector<128x192xbf16>
    %c0_23 = arith.constant 0 : index
    %c0_24 = arith.constant 0 : index
    %c0_25 = arith.constant 0 : index
    %29 = vector.load %arg10[%c0_23, %c0_24, %c0_25] : memref<2x64x128xbf16, #tpu.memory_space<vmem>>, vector<1x64x128xbf16>
    %30 = vector.shape_cast %29 : vector<1x64x128xbf16> to vector<64x128xbf16>
    %cst_26 = arith.constant dense<0.000000e+00> : vector<64x192xf32>
    %31 = tpu.matmul %30, %28, %cst_26 {dimension_numbers = #tpu.dot_dimension_numbers<[1], [0], [0], [1], [0, 0, 1, 1], [], []>} : vector<64x128xbf16>, vector<128x192xbf16>, vector<64x192xf32> -> vector<64x192xf32>
    %c1_27 = arith.constant 1 : index
    %c0_28 = arith.constant 0 : index
    %c0_29 = arith.constant 0 : index
    %32 = vector.load %arg10[%c1_27, %c0_28, %c0_29] : memref<2x64x128xbf16, #tpu.memory_space<vmem>>, vector<1x64x128xbf16>
    %33 = vector.shape_cast %32 : vector<1x64x128xbf16> to vector<64x128xbf16>
    %cst_30 = arith.constant dense<0.000000e+00> : vector<64x192xf32>
    %34 = tpu.matmul %33, %28, %cst_30 {dimension_numbers = #tpu.dot_dimension_numbers<[1], [0], [0], [1], [0, 0, 1, 1], [], []>} : vector<64x128xbf16>, vector<128x192xbf16>, vector<64x192xf32> -> vector<64x192xf32>
    %35 = arith.maximumf %31, %34 : vector<64x192xf32>
    %36 = arith.truncf %35 : vector<64x192xf32> to vector<64x192xbf16>
    %c0_31 = arith.constant 0 : index
    %c0_32 = arith.constant 0 : index
    %c0_33 = arith.constant 0 : index
    %37 = vector.load %arg11[%c0_31, %c0_32, %c0_33] : memref<2x192x96xbf16, #tpu.memory_space<vmem>>, vector<1x192x96xbf16>
    %38 = vector.shape_cast %37 : vector<1x192x96xbf16> to vector<192x96xbf16>
    %cst_34 = arith.constant dense<0.000000e+00> : vector<64x96xf32>
    %39 = tpu.matmul %36, %38, %cst_34 {dimension_numbers = #tpu.dot_dimension_numbers<[1], [0], [0], [1], [0, 0, 1, 1], [], []>} : vector<64x192xbf16>, vector<192x96xbf16>, vector<64x96xf32> -> vector<64x96xf32>
    %c1_35 = arith.constant 1 : index
    %c0_36 = arith.constant 0 : index
    %c0_37 = arith.constant 0 : index
    %40 = vector.load %arg11[%c1_35, %c0_36, %c0_37] : memref<2x192x96xbf16, #tpu.memory_space<vmem>>, vector<1x192x96xbf16>
    %41 = vector.shape_cast %40 : vector<1x192x96xbf16> to vector<192x96xbf16>
    %cst_38 = arith.constant dense<0.000000e+00> : vector<64x96xf32>
    %42 = tpu.matmul %36, %41, %cst_38 {dimension_numbers = #tpu.dot_dimension_numbers<[1], [0], [0], [1], [0, 0, 1, 1], [], []>} : vector<64x192xbf16>, vector<192x96xbf16>, vector<64x96xf32> -> vector<64x96xf32>
    %43 = arith.maximumf %39, %42 : vector<64x96xf32>
    %44 = arith.truncf %43 : vector<64x96xf32> to vector<64x96xbf16>
    %c0_39 = arith.constant 0 : index
    %c0_40 = arith.constant 0 : index
    %c0_41 = arith.constant 0 : index
    %45 = vector.load %arg3[%c0_39, %c0_40, %c0_41] : memref<2x64x64xbf16, #tpu.memory_space<vmem>>, vector<1x64x64xbf16>
    %46 = vector.shape_cast %45 : vector<1x64x64xbf16> to vector<64x64xbf16>
    %cst_42 = arith.constant dense<0.000000e+00> : vector<64x96xf32>
    %47 = tpu.matmul %46, %44, %cst_42 {dimension_numbers = #tpu.dot_dimension_numbers<[1], [0], [0], [1], [0, 0, 1, 1], [], []>} : vector<64x64xbf16>, vector<64x96xbf16>, vector<64x96xf32> -> vector<64x96xf32>
    %48 = arith.truncf %47 : vector<64x96xf32> to vector<64x96xbf16>
    %c1_43 = arith.constant 1 : index
    %c0_44 = arith.constant 0 : index
    %c0_45 = arith.constant 0 : index
    %49 = vector.load %arg3[%c1_43, %c0_44, %c0_45] : memref<2x64x64xbf16, #tpu.memory_space<vmem>>, vector<1x64x64xbf16>
    %50 = vector.shape_cast %49 : vector<1x64x64xbf16> to vector<64x64xbf16>
    %cst_46 = arith.constant dense<0.000000e+00> : vector<64x96xf32>
    %51 = tpu.matmul %50, %44, %cst_46 {dimension_numbers = #tpu.dot_dimension_numbers<[1], [0], [0], [1], [0, 0, 1, 1], [], []>} : vector<64x64xbf16>, vector<64x96xbf16>, vector<64x96xf32> -> vector<64x96xf32>
    %52 = arith.truncf %51 : vector<64x96xf32> to vector<64x96xbf16>
    %c0_47 = arith.constant 0 : index
    %c0_48 = arith.constant 0 : index
    %c0_49 = arith.constant 0 : index
    %53 = vector.load %arg6[%c0_47, %c0_48, %c0_49] : memref<3x96x160xbf16, #tpu.memory_space<vmem>>, vector<1x96x160xbf16>
    %54 = vector.shape_cast %53 : vector<1x96x160xbf16> to vector<96x160xbf16>
    %cst_50 = arith.constant dense<0.000000e+00> : vector<64x160xf32>
    %55 = tpu.matmul %48, %54, %cst_50 {dimension_numbers = #tpu.dot_dimension_numbers<[1], [0], [0], [1], [0, 0, 1, 1], [], []>} : vector<64x96xbf16>, vector<96x160xbf16>, vector<64x160xf32> -> vector<64x160xf32>
    %c1_51 = arith.constant 1 : index
    %c0_52 = arith.constant 0 : index
    %c0_53 = arith.constant 0 : index
    %56 = vector.load %arg6[%c1_51, %c0_52, %c0_53] : memref<3x96x160xbf16, #tpu.memory_space<vmem>>, vector<1x96x160xbf16>
    %57 = vector.shape_cast %56 : vector<1x96x160xbf16> to vector<96x160xbf16>
    %cst_54 = arith.constant dense<0.000000e+00> : vector<64x160xf32>
    %58 = tpu.matmul %44, %57, %cst_54 {dimension_numbers = #tpu.dot_dimension_numbers<[1], [0], [0], [1], [0, 0, 1, 1], [], []>} : vector<64x96xbf16>, vector<96x160xbf16>, vector<64x160xf32> -> vector<64x160xf32>
    %59 = arith.addf %55, %58 : vector<64x160xf32>
    %c2_55 = arith.constant 2 : index
    %c0_56 = arith.constant 0 : index
    %c0_57 = arith.constant 0 : index
    %60 = vector.load %arg6[%c2_55, %c0_56, %c0_57] : memref<3x96x160xbf16, #tpu.memory_space<vmem>>, vector<1x96x160xbf16>
    %61 = vector.shape_cast %60 : vector<1x96x160xbf16> to vector<96x160xbf16>
    %cst_58 = arith.constant dense<0.000000e+00> : vector<64x160xf32>
    %62 = tpu.matmul %52, %61, %cst_58 {dimension_numbers = #tpu.dot_dimension_numbers<[1], [0], [0], [1], [0, 0, 1, 1], [], []>} : vector<64x96xbf16>, vector<96x160xbf16>, vector<64x160xf32> -> vector<64x160xf32>
    %63 = arith.addf %59, %62 : vector<64x160xf32>
    %c0_59 = arith.constant 0 : index
    %c0_60 = arith.constant 0 : index
    %64 = vector.load %arg7[%c0_59, %c0_60] : memref<2x160xf32, #tpu.memory_space<vmem>>, vector<1x160xf32>
    %65 = vector.broadcast %64 : vector<1x160xf32> to vector<64x160xf32>
    %66 = arith.mulf %63, %65 : vector<64x160xf32>
    %c1_61 = arith.constant 1 : index
    %c0_62 = arith.constant 0 : index
    %67 = vector.load %arg7[%c1_61, %c0_62] : memref<2x160xf32, #tpu.memory_space<vmem>>, vector<1x160xf32>
    %68 = vector.broadcast %67 : vector<1x160xf32> to vector<64x160xf32>
    %69 = arith.addf %66, %68 : vector<64x160xf32>
    %cst_63 = arith.constant 0.000000e+00 : f32
    %70 = vector.broadcast %cst_63 : f32 to vector<64x160xf32>
    %71 = arith.maximumf %69, %70 : vector<64x160xf32>
    %72 = arith.truncf %71 : vector<64x160xf32> to vector<64x160xbf16>
    %c0_64 = arith.constant 0 : index
    %c0_65 = arith.constant 0 : index
    %c0_66 = arith.constant 0 : index
    %73 = vector.load %arg3[%c0_64, %c0_65, %c0_66] : memref<2x64x64xbf16, #tpu.memory_space<vmem>>, vector<1x64x64xbf16>
    %74 = vector.shape_cast %73 : vector<1x64x64xbf16> to vector<64x64xbf16>
    %cst_67 = arith.constant dense<0.000000e+00> : vector<64x160xf32>
    %75 = tpu.matmul %74, %72, %cst_67 {dimension_numbers = #tpu.dot_dimension_numbers<[1], [0], [0], [1], [0, 0, 1, 1], [], []>} : vector<64x64xbf16>, vector<64x160xbf16>, vector<64x160xf32> -> vector<64x160xf32>
    %76 = arith.truncf %75 : vector<64x160xf32> to vector<64x160xbf16>
    %c1_68 = arith.constant 1 : index
    %c0_69 = arith.constant 0 : index
    %c0_70 = arith.constant 0 : index
    %77 = vector.load %arg3[%c1_68, %c0_69, %c0_70] : memref<2x64x64xbf16, #tpu.memory_space<vmem>>, vector<1x64x64xbf16>
    %78 = vector.shape_cast %77 : vector<1x64x64xbf16> to vector<64x64xbf16>
    %cst_71 = arith.constant dense<0.000000e+00> : vector<64x160xf32>
    %79 = tpu.matmul %78, %72, %cst_71 {dimension_numbers = #tpu.dot_dimension_numbers<[1], [0], [0], [1], [0, 0, 1, 1], [], []>} : vector<64x64xbf16>, vector<64x160xbf16>, vector<64x160xf32> -> vector<64x160xf32>
    %80 = arith.truncf %79 : vector<64x160xf32> to vector<64x160xbf16>
    %c0_72 = arith.constant 0 : index
    %c0_73 = arith.constant 0 : index
    %c0_74 = arith.constant 0 : index
    %81 = vector.load %arg8[%c0_72, %c0_73, %c0_74] : memref<3x160x256xbf16, #tpu.memory_space<vmem>>, vector<1x160x256xbf16>
    %82 = vector.shape_cast %81 : vector<1x160x256xbf16> to vector<160x256xbf16>
    %cst_75 = arith.constant dense<0.000000e+00> : vector<64x256xf32>
    %83 = tpu.matmul %76, %82, %cst_75 {dimension_numbers = #tpu.dot_dimension_numbers<[1], [0], [0], [1], [0, 0, 1, 1], [], []>} : vector<64x160xbf16>, vector<160x256xbf16>, vector<64x256xf32> -> vector<64x256xf32>
    %c1_76 = arith.constant 1 : index
    %c0_77 = arith.constant 0 : index
    %c0_78 = arith.constant 0 : index
    %84 = vector.load %arg8[%c1_76, %c0_77, %c0_78] : memref<3x160x256xbf16, #tpu.memory_space<vmem>>, vector<1x160x256xbf16>
    %85 = vector.shape_cast %84 : vector<1x160x256xbf16> to vector<160x256xbf16>
    %cst_79 = arith.constant dense<0.000000e+00> : vector<64x256xf32>
    %86 = tpu.matmul %72, %85, %cst_79 {dimension_numbers = #tpu.dot_dimension_numbers<[1], [0], [0], [1], [0, 0, 1, 1], [], []>} : vector<64x160xbf16>, vector<160x256xbf16>, vector<64x256xf32> -> vector<64x256xf32>
    %87 = arith.addf %83, %86 : vector<64x256xf32>
    %c2_80 = arith.constant 2 : index
    %c0_81 = arith.constant 0 : index
    %c0_82 = arith.constant 0 : index
    %88 = vector.load %arg8[%c2_80, %c0_81, %c0_82] : memref<3x160x256xbf16, #tpu.memory_space<vmem>>, vector<1x160x256xbf16>
    %89 = vector.shape_cast %88 : vector<1x160x256xbf16> to vector<160x256xbf16>
    %cst_83 = arith.constant dense<0.000000e+00> : vector<64x256xf32>
    %90 = tpu.matmul %80, %89, %cst_83 {dimension_numbers = #tpu.dot_dimension_numbers<[1], [0], [0], [1], [0, 0, 1, 1], [], []>} : vector<64x160xbf16>, vector<160x256xbf16>, vector<64x256xf32> -> vector<64x256xf32>
    %91 = arith.addf %87, %90 : vector<64x256xf32>
    %c0_84 = arith.constant 0 : index
    %c0_85 = arith.constant 0 : index
    %92 = vector.load %arg9[%c0_84, %c0_85] : memref<2x256xf32, #tpu.memory_space<vmem>>, vector<1x256xf32>
    %93 = vector.broadcast %92 : vector<1x256xf32> to vector<64x256xf32>
    %94 = arith.mulf %91, %93 : vector<64x256xf32>
    %c1_86 = arith.constant 1 : index
    %c0_87 = arith.constant 0 : index
    %95 = vector.load %arg9[%c1_86, %c0_87] : memref<2x256xf32, #tpu.memory_space<vmem>>, vector<1x256xf32>
    %96 = vector.broadcast %95 : vector<1x256xf32> to vector<64x256xf32>
    %97 = arith.addf %94, %96 : vector<64x256xf32>
    %cst_88 = arith.constant 0.000000e+00 : f32
    %98 = vector.broadcast %cst_88 : f32 to vector<64x256xf32>
    %99 = arith.maximumf %97, %98 : vector<64x256xf32>
    %100 = arith.truncf %99 : vector<64x256xf32> to vector<64x256xbf16>
    %c0_89 = arith.constant 0 : index
    %c0_90 = arith.constant 0 : index
    %101 = vector.load %arg12[%c0_89, %c0_90] : memref<256x40xbf16, #tpu.memory_space<vmem>>, vector<256x40xbf16>
    %cst_91 = arith.constant dense<0.000000e+00> : vector<64x40xf32>
    %102 = tpu.matmul %100, %101, %cst_91 {dimension_numbers = #tpu.dot_dimension_numbers<[1], [0], [0], [1], [0, 0, 1, 1], [], []>} : vector<64x256xbf16>, vector<256x40xbf16>, vector<64x40xf32> -> vector<64x40xf32>
    %c0_92 = arith.constant 0 : index
    %c0_93 = arith.constant 0 : index
    %103 = vector.load %arg13[%c0_92, %c0_93] : memref<64x40xf32, #tpu.memory_space<vmem>>, vector<64x40xf32>
    %104 = arith.mulf %102, %103 : vector<64x40xf32>
    %c0_94 = arith.constant 0 : index
    %c0_95 = arith.constant 0 : index
    %105 = vector.load %arg14[%c0_94, %c0_95] : memref<8x64xf32, #tpu.memory_space<vmem>>, vector<8x64xf32>
    %cst_96 = arith.constant dense<0.000000e+00> : vector<8x40xf32>
    %106 = tpu.matmul %105, %104, %cst_96 {dimension_numbers = #tpu.dot_dimension_numbers<[1], [0], [0], [1], [0, 0, 1, 1], [], []>} : vector<8x64xf32>, vector<64x40xf32>, vector<8x40xf32> -> vector<8x40xf32>
    %c0_97 = arith.constant 0 : index
    %c0_98 = arith.constant 0 : index
    %107 = vector.load %arg15[%c0_97, %c0_98] : memref<40x128xf32, #tpu.memory_space<vmem>>, vector<40x128xf32>
    %cst_99 = arith.constant dense<0.000000e+00> : vector<8x128xf32>
    %108 = tpu.matmul %106, %107, %cst_99 {dimension_numbers = #tpu.dot_dimension_numbers<[1], [0], [0], [1], [0, 0, 1, 1], [], []>} : vector<8x40xf32>, vector<40x128xf32>, vector<8x128xf32> -> vector<8x128xf32>
    %c0_100 = arith.constant 0 : index
    %c0_101 = arith.constant 0 : index
    %109 = vector.load %arg16[%c0_100, %c0_101] : memref<1x128xf32, #tpu.memory_space<vmem>>, vector<1x128xf32>
    %110 = vector.broadcast %109 : vector<1x128xf32> to vector<8x128xf32>
    %111 = arith.addf %108, %110 : vector<8x128xf32>
    %c0_102 = arith.constant 0 : index
    %c0_103 = arith.constant 0 : index
    %112 = vector.load %arg17[%c0_102, %c0_103] : memref<8x128xf32, #tpu.memory_space<vmem>>, vector<8x128xf32>
    tpu.vector_store %arg17[%c0_102, %c0_103], %111 {strides = array<i32>} : memref<8x128xf32, #tpu.memory_space<vmem>>, vector<8x128xf32>,
    return
  }
  func.func @transform_0(%arg0: i32) -> (i32, i32) {
    %c0_i32 = arith.constant 0 : i32
    %c0_i32_0 = arith.constant 0 : i32
    return %arg0, %c0_i32 : i32, i32
  }
  func.func @transform_1(%arg0: i32) -> (i32, i32, i32) {
    %c0_i32 = arith.constant 0 : i32
    %c0_i32_0 = arith.constant 0 : i32
    %c0_i32_1 = arith.constant 0 : i32
    %c0_i32_2 = arith.constant 0 : i32
    return %c0_i32, %c0_i32_0, %c0_i32_1 : i32, i32, i32
  }
  func.func @transform_2(%arg0: i32) -> (i32, i32, i32) {
    %c0_i32 = arith.constant 0 : i32
    %c0_i32_0 = arith.constant 0 : i32
    %c0_i32_1 = arith.constant 0 : i32
    %c0_i32_2 = arith.constant 0 : i32
    return %c0_i32, %c0_i32_0, %c0_i32_1 : i32, i32, i32
  }
  func.func @transform_3(%arg0: i32) -> (i32, i32, i32) {
    %c0_i32 = arith.constant 0 : i32
    %c0_i32_0 = arith.constant 0 : i32
    %c0_i32_1 = arith.constant 0 : i32
    %c0_i32_2 = arith.constant 0 : i32
    return %c0_i32, %c0_i32_0, %c0_i32_1 : i32, i32, i32
  }
  func.func @transform_4(%arg0: i32) -> (i32, i32) {
    %c0_i32 = arith.constant 0 : i32
    %c0_i32_0 = arith.constant 0 : i32
    %c0_i32_1 = arith.constant 0 : i32
    return %c0_i32, %c0_i32_0 : i32, i32
  }
  func.func @transform_5(%arg0: i32) -> (i32, i32, i32) {
    %c0_i32 = arith.constant 0 : i32
    %c0_i32_0 = arith.constant 0 : i32
    %c0_i32_1 = arith.constant 0 : i32
    %c0_i32_2 = arith.constant 0 : i32
    return %c0_i32, %c0_i32_0, %c0_i32_1 : i32, i32, i32
  }
  func.func @transform_6(%arg0: i32) -> (i32, i32) {
    %c0_i32 = arith.constant 0 : i32
    %c0_i32_0 = arith.constant 0 : i32
    %c0_i32_1 = arith.constant 0 : i32
    return %c0_i32, %c0_i32_0 : i32, i32
  }
  func.func @transform_7(%arg0: i32) -> (i32, i32, i32) {
    %c0_i32 = arith.constant 0 : i32
    %c0_i32_0 = arith.constant 0 : i32
    %c0_i32_1 = arith.constant 0 : i32
    %c0_i32_2 = arith.constant 0 : i32
    return %c0_i32, %c0_i32_0, %c0_i32_1 : i32, i32, i32
  }
  func.func @transform_8(%arg0: i32) -> (i32, i32) {
    %c0_i32 = arith.constant 0 : i32
    %c0_i32_0 = arith.constant 0 : i32
    %c0_i32_1 = arith.constant 0 : i32
    return %c0_i32, %c0_i32_0 : i32, i32
  }
  func.func @transform_9(%arg0: i32) -> (i32, i32, i32) {
    %c0_i32 = arith.constant 0 : i32
    %c0_i32_0 = arith.constant 0 : i32
    %c0_i32_1 = arith.constant 0 : i32
    %c0_i32_2 = arith.constant 0 : i32
    return %c0_i32, %c0_i32_0, %c0_i32_1 : i32, i32, i32
  }
  func.func @transform_10(%arg0: i32) -> (i32, i32, i32) {
    %c0_i32 = arith.constant 0 : i32
    %c0_i32_0 = arith.constant 0 : i32
    %c0_i32_1 = arith.constant 0 : i32
    %c0_i32_2 = arith.constant 0 : i32
    return %c0_i32, %c0_i32_0, %c0_i32_1 : i32, i32, i32
  }
  func.func @transform_11(%arg0: i32) -> (i32, i32) {
    %c0_i32 = arith.constant 0 : i32
    %c0_i32_0 = arith.constant 0 : i32
    %c0_i32_1 = arith.constant 0 : i32
    return %c0_i32, %c0_i32_0 : i32, i32
  }
  func.func @transform_12(%arg0: i32) -> (i32, i32) {
    %c0_i32 = arith.constant 0 : i32
    %c0_i32_0 = arith.constant 0 : i32
    %c0_i32_1 = arith.constant 0 : i32
    return %c0_i32, %c0_i32_0 : i32, i32
  }
  func.func @transform_13(%arg0: i32) -> (i32, i32) {
    %c0_i32 = arith.constant 0 : i32
    %c0_i32_0 = arith.constant 0 : i32
    %c0_i32_1 = arith.constant 0 : i32
    return %c0_i32, %c0_i32_0 : i32, i32
  }
  func.func @transform_14(%arg0: i32) -> (i32, i32) {
    %c0_i32 = arith.constant 0 : i32
    %c0_i32_0 = arith.constant 0 : i32
    %c0_i32_1 = arith.constant 0 : i32
    return %c0_i32, %c0_i32_0 : i32, i32
  }
  func.func @transform_15(%arg0: i32) -> (i32, i32) {
    %c0_i32 = arith.constant 0 : i32
    %c0_i32_0 = arith.constant 0 : i32
    %c0_i32_1 = arith.constant 0 : i32
    return %c0_i32, %c0_i32_0 : i32, i32
  }
  func.func @transform_16(%arg0: i32) -> (i32, i32) {
    %c0_i32 = arith.constant 0 : i32
    %c0_i32_0 = arith.constant 0 : i32
    return %arg0, %c0_i32 : i32, i32
  }
}

</mosaic_0001>

<bundles_post_ra>
// kernel: convnet_forward.1
= control target key start
LH: loop header
LB: loop body
LE: loop exit
PB: predicated region body
PF: predicated region fallthrough
CT: control target
= control target key end

     0   :  { %s5465_s21 = smov 0   ;;  %s6724_s0 = inlined_call_operand.vmem [shape: bf16[256,48], index: 0, kind: input, shape index: {}]   ;;  %s6725_s1 = inlined_call_operand.vmem [shape: bf16[2,128,128], index: 1, kind: input, shape index: {}]   ;;  %s6726_s2 = inlined_call_operand.vmem [shape: bf16[2,64,64], index: 2, kind: input, shape index: {}]   ;;  %s6727_s3 = inlined_call_operand.vmem [shape: bf16[3,48,192], index: 3, kind: input, shape index: {}]   ;;  %s6728_s4 = inlined_call_operand.vmem [shape: f32[2,192], index: 4, kind: input, shape index: {}]   ;;  %s6729_s5 = inlined_call_operand.vmem [shape: bf16[3,96,160], index: 5, kind: input, shape index: {}]   ;;  %s6730_s6 = inlined_call_operand.vmem [shape: f32[2,160], index: 6, kind: input, shape index: {}]   ;;  %s6731_s7 = inlined_call_operand.vmem [shape: bf16[3,160,256], index: 7, kind: input, shape index: {}]   ;;  %s6732_s8 = inlined_call_operand.vmem [shape: f32[2,256], index: 8, kind: input, shape index: {}]   ;;  %s6733_s9 = inlined_call_operand.vmem [shape: bf16[2,64,128], index: 9, kind: input, shape index: {}]   ;;  %s6734_s10 = inlined_call_operand.vmem [shape: bf16[2,192,96], index: 10, kind: input, shape index: {}]   ;;  %s6735_s11 = inlined_call_operand.vmem [shape: bf16[256,40], index: 11, kind: input, shape index: {}]   ;;  %s6736_s12 = inlined_call_operand.vmem [shape: f32[64,40], index: 12, kind: input, shape index: {}]   ;;  %s6737_s13 = inlined_call_operand.vmem [shape: f32[8,64], index: 13, kind: input, shape index: {}]   ;;  %s6738_s14 = inlined_call_operand.vmem [shape: f32[40,128], index: 14, kind: input, shape index: {}]   ;;  %s6739_s15 = inlined_call_operand.vmem [shape: f32[1,128], index: 15, kind: input, shape index: {}]   ;;  %s6740_s16 = inlined_call_operand.vmem [shape: f32[16,128], index: 16, kind: output, shape index: {}]  }
   0x1   :  { %6741 = sst [smem:[#allocation2_spill]] %s6724_s0 }
   0x2 LB: > { %s5471_s22 = sadd.s32 4294967295, %s5374_s21   ;;  %p4294_p0 = scmp.ge.s32.totalorder %s5374_s21, 1  ;;  %s5374_s21 = sphi %s5465_s21, %s26_s21  }
   0x3   : > { %p463_p1 = scmp.lt.s32.totalorder %s5374_s21, 3 }
   0x5   : > { %p464_p2 = pnand %p4294_p0, %p463_p1 }
   0x6   : > { %s4295_s23 = sshll.u32 (!%p464_p2), %s5471_s22, 4  ;;  %v5125_v0 = vld [vmem:[%s6725_s1] sm:$0xff] (!%p464_p2)   ;;  %s6742_s29 = sld [smem:[#allocation2_spill]] (!%p464_p2)  ;;  %v5143_v10 = vld [vmem:[%s6727_s3 + $0x34] ss:$8 sps:$4 sm:$0xff] (!%p464_p2)   ;;  %v5126_v11 = vld [vmem:[%s6725_s1 + $0x8] sm:$0xff] (!%p464_p2)  }
   0x7   : > { %467 = sbr.rel (%p464_p2) target bundleno = 2801 (0xaf1), region = 84  ;;  %p513_p3 = scmp.lt.s32.totalorder (!%p464_p2), %s4295_s23, 31  ;;  %4823 = vmatprep.mubr.bf16.mxu0 (!%p464_p2), %v5125_v0  ;;  %v5133_v5 = vld [vmem:[%s6725_s1 + $0x40] sm:$0xff] (!%p464_p2)   ;;  %v5134_v12 = vld [vmem:[%s6725_s1 + $0x48] sm:$0xff] (!%p464_p2)   ;;  %v5127_v13 = vld [vmem:[%s6725_s1 + $0x10] sm:$0xff] (!%p464_p2)   ;;  %v5376_v31 = vmov (!%p464_p2), 0  }
   0x8   : > { %4855 = vmatprep.mubr.bf16.mxu1 (!%p464_p2), %v5133_v5  ;;  %v5135_v14 = vld [vmem:[%s6725_s1 + $0x50] sm:$0xff] (!%p464_p2)   ;;  %v5146_v16 = vld [vmem:[%s6727_s3 + $0x44] ss:$8 sps:$4 sm:$0xff] (!%p464_p2)   ;;  %v5144_v17 = vld [vmem:[%s6727_s3 + $0x40] ss:$8 sps:$4 sm:$0xff] (!%p464_p2)   ;;  %vm969_vm0 = vcmask (!%p464_p2), 392192  }
   0x9   : > { %v5141_v15 = vld [vmem:[%s6727_s3 + $0x30] ss:$8 sps:$4 sm:$0xff] (!%p464_p2)   ;;  %v5149_v18 = vld [vmem:[%s6727_s3 + $0x54] ss:$8 sps:$4 sm:$0xff] (!%p464_p2)   ;;  %v5129_v21 = vld [vmem:[%s6725_s1 + $0x20] sm:$0xff] (!%p464_p2)   ;;  %vm1948_vm1 = vcmask (!%p464_p2), 523264  }
   0xa   : > { %v5128_v19 = vld [vmem:[%s6725_s1 + $0x18] sm:$0xff] (!%p464_p2)   ;;  %v5137_v22 = vld [vmem:[%s6725_s1 + $0x60] sm:$0xff] (!%p464_p2)   ;;  %v5130_v25 = vld [vmem:[%s6725_s1 + $0x28] sm:$0xff] (!%p464_p2)   ;;  %vm2504_vm2 = vcmask (!%p464_p2), 785408   ;;  %vm3293_vm3 = vcmask (!%p464_p2), 261120   ;;  %vm5378_vm4 = vmmov (!%p464_p2), 0  }
   0xb   : > { %v5136_v20 = vld [vmem:[%s6725_s1 + $0x58] sm:$0xff] (!%p464_p2)   ;;  %v5152_v24 = vld [vmem:[%s6727_s3 + $0x4] ss:$8 sps:$4 sm:$0xff] (!%p464_p2)   ;;  %v5131_v27 = vld [vmem:[%s6725_s1 + $0x30] sm:$0xff] (!%p464_p2)   ;;  %vm4162_vm5 = vcmask (!%p464_p2), 326656   ;;  %p518_p4 = scmp.lt.s32.totalorder (!%p464_p2), %s5471_s22, 1 }
   0xc   : > { %v5147_v23 = vld [vmem:[%s6727_s3 + $0x50] ss:$8 sps:$4 sm:$0xff] (!%p464_p2)   ;;  %v5138_v26 = vld [vmem:[%s6725_s1 + $0x68] sm:$0xff] (!%p464_p2)   ;;  %v5155_v33 = vld [vmem:[%s6727_s3 + $0x14] ss:$8 sps:$4 sm:$0xff] (!%p464_p2)  }
   0xd   : > { %v5139_v28 = vld [vmem:[%s6725_s1 + $0x70] sm:$0xff] (!%p464_p2)   ;;  %v5132_v29 = vld [vmem:[%s6725_s1 + $0x38] sm:$0xff] (!%p464_p2)   ;;  %v5150_v32 = vld [vmem:[%s6727_s3] ss:$8 sps:$4 sm:$0xff] (!%p464_p2)  }
   0xe   : > { %s6744_s23 = smov (!%p513_p3, %s4295_s23), 31  ;;  %v5140_v30 = vld [vmem:[%s6725_s1 + $0x78] sm:$0xff]   ;;  %v5158_v35 = vld [vmem:[%s6727_s3 + $0x24] ss:$8 sps:$4 sm:$0xff]   ;;  %v5156_v36 = vld [vmem:[%s6727_s3 + $0x20] ss:$8 sps:$4 sm:$0xff]  }
   0xf   : > { %s4296_s26 = sshll.u32 %s6744_s23, 2  ;;  %v5153_v34 = vld [vmem:[%s6727_s3 + $0x10] ss:$8 sps:$4 sm:$0xff]   ;;  %v5161_v37 = vld [vmem:[%s6727_s3 + $0x64] ss:$8 sps:$4 sm:$0xff]   ;;  %s6746_s22 = smov (!%p518_p4, %s5471_s22), 1 }
  0x10   : > { %s5482_s30 = scalar_lea.vmem %s6742_s29, %s4296_s26  ;;  %v5159_v46 = vld [vmem:[%s6727_s3 + $0x60] ss:$8 sps:$4 sm:$0xff]   ;;  %v5164_v50 = vld [vmem:[%s6727_s3 + $0x74] ss:$8 sps:$4 sm:$0xff]   ;;  %v5162_v52 = vld [vmem:[%s6727_s3 + $0x70] ss:$8 sps:$4 sm:$0xff]  }
  0x11   : > { %v5485_v1 = vld [vmem:[%s5482_s30] sm:$0xff]   ;;  %v5488_v2 = vld [vmem:[%s5482_s30 + $0x8] sm:$0xff]   ;;  %v5496_v3 = vld [vmem:[%s5482_s30 + $0x10] sm:$0xff]   ;;  %s4297_s25 = sshll.u32 %s6746_s22, 3 }
  0x12   : > { %4807 = vmatprep.subr.bf16.mxu0 %v5485_v1  ;;  %4839 = vmatprep.subr.bf16.mxu1 %v5485_v1  ;;  %v5503_v4 = vld [vmem:[%s5482_s30 + $0x18] sm:$0xff]   ;;  %v5513_v6 = vld [vmem:[%s5482_s30 + $0x20] sm:$0xff]   ;;  %v5520_v7 = vld [vmem:[%s5482_s30 + $0x28] sm:$0xff]  }
  0x13   : > { %4808 = vmatpush3.bf16.msra.mxu0 %v5485_v1  ;;  %4840 = vmatpush3.bf16.msra.mxu1 %v5485_v1  ;;  %v5527_v8 = vld [vmem:[%s5482_s30 + $0x30] sm:$0xff]   ;;  %v5534_v9 = vld [vmem:[%s5482_s30 + $0x38] sm:$0xff]   ;;  %v5167_v54 = vld [vmem:[%s6727_s3 + $0x84] ss:$8 sps:$4 sm:$0xff]   ;;  %s521_s30 = scalar_lea.vmem %s6740_s16, %s4297_s25 }
  0x14   : > { %4809 = vmatprep.subr.bf16.mxu0 %v5488_v2  ;;  %4841 = vmatprep.subr.bf16.mxu1 %v5488_v2  ;;  %v5165_v62 = vld [vmem:[%s6727_s3 + $0x80] ss:$8 sps:$4 sm:$0xff]  }
  0x17   : > { %4810 = vmatpush3.bf16.msra.mxu0 %v5488_v2  ;;  %4842 = vmatpush3.bf16.msra.mxu1 %v5488_v2 }
  0x18   : > { %4811 = vmatprep.subr.bf16.mxu0 %v5496_v3  ;;  %4843 = vmatprep.subr.bf16.mxu1 %v5496_v3 }
  0x1b   : > { %4812 = vmatpush3.bf16.msra.mxu0 %v5496_v3  ;;  %4844 = vmatpush3.bf16.msra.mxu1 %v5496_v3 }
  0x1c   : > { %4813 = vmatprep.subr.bf16.mxu0 %v5503_v4  ;;  %4845 = vmatprep.subr.bf16.mxu1 %v5503_v4 }
  0x1f   : > { %4814 = vmatpush3.bf16.msra.mxu0 %v5503_v4  ;;  %4846 = vmatpush3.bf16.msra.mxu1 %v5503_v4 }
  0x20   : > { %4815 = vmatprep.subr.bf16.mxu0 %v5513_v6  ;;  %4847 = vmatprep.subr.bf16.mxu1 %v5513_v6 }
  0x23   : > { %4816 = vmatpush3.bf16.msra.mxu0 %v5513_v6  ;;  %4848 = vmatpush3.bf16.msra.mxu1 %v5513_v6 }
  0x24   : > { %4817 = vmatprep.subr.bf16.mxu0 %v5520_v7  ;;  %4849 = vmatprep.subr.bf16.mxu1 %v5520_v7 }
  0x27   : > { %4818 = vmatpush3.bf16.msra.mxu0 %v5520_v7  ;;  %4850 = vmatpush3.bf16.msra.mxu1 %v5520_v7 }
  0x28   : > { %4819 = vmatprep.subr.bf16.mxu0 %v5527_v8  ;;  %4851 = vmatprep.subr.bf16.mxu1 %v5527_v8 }
  0x2b   : > { %4820 = vmatpush3.bf16.msra.mxu0 %v5527_v8  ;;  %4852 = vmatpush3.bf16.msra.mxu1 %v5527_v8 }
  0x2c   : > { %4821 = vmatprep.subr.bf16.mxu0 %v5534_v9  ;;  %4853 = vmatprep.subr.bf16.mxu1 %v5534_v9 }
  0x2f   : > { %4822 = vmatpush3.bf16.msra.mxu0 %v5534_v9  ;;  %4854 = vmatpush3.bf16.msra.mxu1 %v5534_v9 }
  0x30   : > { %994 = vmatprep.subr.bf16.mxu0 %v5143_v10 }
  0x32   : > { %4824 = vmatmul.mubr.bf16.vlgmr.msra.gmra.mrb[0].mxu0 %v5126_v11  ;;  %4856 = vmatmul.mubr.bf16.vlgmr.msra.gmra.mrb[0].mxu1 %v5134_v12 }
  0x33   : > { %4827 = vmatprep.mubr.bf16.mxu0 %v5127_v13  ;;  %4859 = vmatprep.mubr.bf16.mxu1 %v5135_v14 }
  0x34   : > { %995 = vmatpush1.bf16.msra.mxu0 %v5141_v15 }
  0x35   : > { %996 = vmatprep.subr.bf16.mxu0 %v5146_v16 }
  0x38   : > { %997 = vmatpush1.bf16.msra.mxu0 %v5144_v17 }
  0x39   : > { %998 = vmatprep.subr.bf16.mxu0 %v5149_v18 }
  0x3a   : > { %4828 = vmatmul.mubr.bf16.gmra.mrb[4].mxu0 %v5128_v19  ;;  %4860 = vmatmul.mubr.bf16.gmra.mrb[4].mxu1 %v5136_v20 }
  0x3b   : > { %4831 = vmatprep.mubr.bf16.mxu0 %v5129_v21  ;;  %4863 = vmatprep.mubr.bf16.mxu1 %v5137_v22 }
  0x3c   : > { %999 = vmatpush1.bf16.msra.mxu0 %v5147_v23 }
  0x3d   : > { %1161 = vmatprep.subr.bf16.mxu0 %v5152_v24 }
  0x42   : > { %4832 = vmatmul.mubr.bf16.gmra.mrb[8].mxu0 %v5130_v25  ;;  %4864 = vmatmul.mubr.bf16.gmra.mrb[8].mxu1 %v5138_v26 }
  0x43   : > { %4835 = vmatprep.mubr.bf16.mxu0 %v5131_v27  ;;  %4867 = vmatprep.mubr.bf16.mxu1 %v5139_v28  ;;  %v1482_v27 = vlaneseq }
  0x45   : > { %v1483_v28 = vshrl.u32 %v1482_v27, 7 }
  0x4a   : > { %4836 = vmatmul.mubr.bf16.gmra.mrb[12].mxu0 %v5132_v29  ;;  %4868 = vmatmul.mubr.bf16.gmra.mrb[12].mxu1 %v5140_v30  ;;  %v5712_v29 = vsub.s32 0, %v1483_v28  ;;  %v1480_v30 = vld [vmem:[%s6728_s4] ss:$2 sm:$0x3] }
  0x4b   : > { %1026 = vmatprep.mubr.bf16.mxu0 %v5376_v31  ;;  %1681 = vmatprep.mubr.bf16.mxu1 %v5376_v31 }
  0x52   : > { %4350 = vmatmul.mubr.msk.bf16.vlgmr.msra.gmra.mrb[16].mxu0 %vm969_vm0, %v5485_v1 }
  0x53   : > { %1162 = vmatpush1.bf16.msra.mxu0 %v5150_v32  ;;  %1036 = vmatprep.mubr.bf16.mxu0 %v5376_v31  ;;  %v5717_v32 = vsub.s32 1, %v1483_v28 }
  0x54   : > { %1163 = vmatprep.subr.bf16.mxu0 %v5155_v33  ;;  %v4392_v33 = vld [vmem:[%s6728_s4 + $0x1] ss:$2 sm:$0x3] }
  0x57   : > { %1164 = vmatpush1.bf16.msra.mxu0 %v5153_v34  ;;  %v5723_v34 = vrot.slane %v1480_v30, %v5712_v29 }
  0x58   : > { %1165 = vmatprep.subr.bf16.mxu0 %v5158_v35  ;;  %v5726_v35 = vrot.slane %v1480_v30, %v5717_v32 }
  0x5a   : > { %4351 = vmatmul.mubr.msk.bf16.gmra.mrb[20].mxu0 %vm969_vm0, %v5488_v2 }
  0x5b   : > { %1046 = vmatprep.mubr.bf16.mxu0 %v5376_v31  ;;  %1166 = vmatpush1.bf16.msra.mxu0 %v5156_v36  ;;  %v5729_v36 = vrot.slane %v4392_v33, %v5712_v29 }
  0x5c   : > { %1335 = vmatprep.subr.bf16.mxu0 %v5161_v37 }
  0x62   : > { %4352 = vmatmul.mubr.msk.bf16.gmra.mrb[24].mxu0 %vm969_vm0, %v5496_v3 }
  0x63   : > { %1056 = vmatprep.mubr.bf16.mxu0 %v5376_v31 }
  0x6a   : > { %4353 = vmatmul.mubr.msk.bf16.gmra.mrb[28].mxu0 %vm969_vm0, %v5503_v4 }
  0x6b   : > { %1066 = vmatprep.mubr.bf16.mxu0 %v5376_v31 }
  0x72   : > { %4354 = vmatmul.mubr.msk.bf16.gmra.mrb[32].mxu0 %vm969_vm0, %v5513_v6 }
  0x73   : > { %1076 = vmatprep.mubr.bf16.mxu0 %v5376_v31 }
  0x7a   : > { %4355 = vmatmul.mubr.msk.bf16.gmra.mrb[36].mxu0 %vm969_vm0, %v5520_v7 }
  0x7b   : > { %1086 = vmatprep.mubr.bf16.mxu0 %v5376_v31 }
  0x82   : > { %4356 = vmatmul.mubr.msk.bf16.gmra.mrb[40].mxu0 %vm969_vm0, %v5527_v8 }
  0x83   : > { %1096 = vmatprep.mubr.bf16.mxu0 %v5376_v31 }
  0x8a   : > { %4357 = vmatmul.mubr.msk.bf16.gmra.mrb[44].mxu0 %vm969_vm0, %v5534_v9 }
  0x8b   : > { %1193 = vmatprep.mubr.bf16.mxu0 %v5376_v31 }
 0x105   : > { %v4825_v38 = vpop.f32.mrb[0].mxu0  ;;  %v5650_v39 = vpop.f32.mrb[0].mxu1 }
 0x106   : > { %v685_v40 = vpop.f32.mrb[1].mxu0  ;;  %v5652_v41 = vpop.f32.mrb[1].mxu1 }
 0x107   : > { %v4826_v42 = vpop.f32.mrb[2].mxu0  ;;  %v5654_v43 = vpop.f32.mrb[2].mxu1 }
 0x108   : > { %v749_v44 = vpack.c.bf16 %v4826_v42, %v4825_v38  ;;  %v688_v45 = vpop.f32.mrb[3].mxu0  ;;  %v919_v47 = vpack.c.bf16 %v5654_v43, %v5650_v39  ;;  %v5661_v48 = vpop.f32.mrb[3].mxu1  ;;  %v5732_v38 = vrot.slane %v4392_v33, %v5717_v32  ;;  %v5737_v39 = vld [vmem:[%s6734_s10 + $0x60] sm:$0xff]  }
 0x109   : > { %v748_v49 = vpack.c.bf16 %v688_v45, %v685_v40  ;;  %v918_v51 = vpack.c.bf16 %v5661_v48, %v5652_v41 }
 0x10b   : > { %4364 = vmatmul.mubr.msk.bf16.vlgmr.msra.gmra.mrb[16].mxu0 %vm969_vm0, %v748_v49 }
 0x10c   : > { %1336 = vmatpush1.bf16.msra.mxu0 %v5159_v46  ;;  %1203 = vmatprep.mubr.bf16.mxu0 %v5376_v31 }
 0x10d   : > { %v4829_v53 = vpop.f32.mrb[4].mxu0  ;;  %1337 = vmatprep.subr.bf16.mxu0 %v5164_v50  ;;  %v4861_v55 = vpop.f32.mrb[4].mxu1 }
 0x10e   : > { %v701_v56 = vpop.f32.mrb[5].mxu0  ;;  %v871_v57 = vpop.f32.mrb[5].mxu1 }
 0x10f   : > { %v4830_v58 = vpop.f32.mrb[6].mxu0  ;;  %v4862_v59 = vpop.f32.mrb[6].mxu1 }
 0x110   : > { %v751_v60 = vpack.c.bf16 %v4830_v58, %v4829_v53  ;;  %v704_v61 = vpop.f32.mrb[7].mxu0  ;;  %1338 = vmatpush1.bf16.msra.mxu0 %v5162_v52  ;;  %v921_v63 = vpack.c.bf16 %v4862_v59, %v4861_v55  ;;  %v874_v0 = vpop.f32.mrb[7].mxu1 }
 0x111   : > { %v750_v1 = vpack.c.bf16 %v704_v61, %v701_v56  ;;  %1339 = vmatprep.subr.bf16.mxu0 %v5167_v54  ;;  %v920_v2 = vpack.c.bf16 %v874_v0, %v871_v57 }
 0x113   : > { %4365 = vmatmul.mubr.msk.bf16.gmra.mrb[20].mxu0 %vm969_vm0, %v749_v44  ;;  %v5745_v44 = vld [vmem:[%s6734_s10 + $0x68] sm:$0xff]  }
 0x114   : > { %1213 = vmatprep.mubr.bf16.mxu0 %v5376_v31  ;;  %1340 = vmatpush1.bf16.msra.mxu0 %v5165_v62 }
 0x115   : > { %v4833_v3 = vpop.f32.mrb[8].mxu0  ;;  %v4865_v4 = vpop.f32.mrb[8].mxu1  ;;  %2123 = vmatprep.subr.bf16.mxu0 %v5376_v31 }
 0x116   : > { %v717_v5 = vpop.f32.mrb[9].mxu0  ;;  %v887_v6 = vpop.f32.mrb[9].mxu1 }
 0x117   : > { %v4834_v7 = vpop.f32.mrb[10].mxu0  ;;  %v4866_v8 = vpop.f32.mrb[10].mxu1 }
 0x118   : > { %v753_v9 = vpack.c.bf16 %v4834_v7, %v4833_v3  ;;  %v720_v10 = vpop.f32.mrb[11].mxu0  ;;  %v923_v11 = vpack.c.bf16 %v4866_v8, %v4865_v4  ;;  %v890_v12 = vpop.f32.mrb[11].mxu1 }
 0x119   : > { %v752_v13 = vpack.c.bf16 %v720_v10, %v717_v5  ;;  %v922_v14 = vpack.c.bf16 %v890_v12, %v887_v6 }
 0x11b   : > { %4366 = vmatmul.mubr.msk.bf16.gmra.mrb[24].mxu0 %vm969_vm0, %v750_v1 }
 0x11c   : > { %1223 = vmatprep.mubr.bf16.mxu0 %v5376_v31 }
 0x11d   : > { %v4837_v15 = vpop.f32.mrb[12].mxu0  ;;  %v4869_v16 = vpop.f32.mrb[12].mxu1 }
 0x11e   : > { %v733_v17 = vpop.f32.mrb[13].mxu0  ;;  %v903_v18 = vpop.f32.mrb[13].mxu1 }
 0x11f   : > { %v4838_v19 = vpop.f32.mrb[14].mxu0  ;;  %v4870_v20 = vpop.f32.mrb[14].mxu1 }
 0x120   : > { %v755_v21 = vpack.c.bf16 %v4838_v19, %v4837_v15  ;;  %v736_v22 = vpop.f32.mrb[15].mxu0  ;;  %v925_v23 = vpack.c.bf16 %v4870_v20, %v4869_v16  ;;  %v906_v24 = vpop.f32.mrb[15].mxu1 }
 0x121   : > { %v754_v25 = vpack.c.bf16 %v736_v22, %v733_v17  ;;  %v924_v26 = vpack.c.bf16 %v906_v24, %v903_v18 }
 0x123   : > { %4367 = vmatmul.mubr.msk.bf16.gmra.mrb[28].mxu0 %vm969_vm0, %v751_v60 }
 0x124   : > { %1233 = vmatprep.mubr.bf16.mxu0 %v5376_v31 }
 0x12b   : > { %4368 = vmatmul.mubr.msk.bf16.gmra.mrb[32].mxu0 %vm969_vm0, %v752_v13 }
 0x12c   : > { %1243 = vmatprep.mubr.bf16.mxu0 %v5376_v31 }
 0x133   : > { %4369 = vmatmul.mubr.msk.bf16.gmra.mrb[36].mxu0 %vm969_vm0, %v753_v9 }
 0x134   : > { %1253 = vmatprep.mubr.bf16.mxu0 %v5376_v31 }
 0x13b   : > { %4370 = vmatmul.mubr.msk.bf16.gmra.mrb[40].mxu0 %vm969_vm0, %v754_v25 }
 0x13c   : > { %1263 = vmatprep.mubr.bf16.mxu0 %v5376_v31 }
 0x143   : > { %4371 = vmatmul.mubr.msk.bf16.gmra.mrb[44].mxu0 %vm969_vm0, %v755_v21 }
 0x144   : > { %1367 = vmatprep.mubr.bf16.mxu0 %v5376_v31 }
 0x14b   : > { %4384 = vmatmul.mubr.msk.bf16.vlgmr.msra.gmra.mrb[16].mxu0 %vm969_vm0, %v918_v51 }
 0x14c   : > { %1377 = vmatprep.mubr.bf16.mxu0 %v5376_v31  ;;  %2124 = vmatpush1.bf16.msra.mxu0 %v5737_v39 }
 0x14d   : > { %2125 = vmatprep.subr.bf16.mxu0 %v5376_v31 }
 0x150   : > { %2126 = vmatpush1.bf16.msra.mxu0 %v5745_v44 }
 0x151   : > { %2127 = vmatprep.subr.bf16.mxu0 %v5376_v31 }
 0x153   : > { %4385 = vmatmul.mubr.msk.bf16.gmra.mrb[20].mxu0 %vm969_vm0, %v919_v47 }
 0x154   : > { %1387 = vmatprep.mubr.bf16.mxu0 %v5376_v31 }
 0x15b   : > { %4386 = vmatmul.mubr.msk.bf16.gmra.mrb[24].mxu0 %vm969_vm0, %v920_v2 }
 0x15c   : > { %1397 = vmatprep.mubr.bf16.mxu0 %v5376_v31 }
 0x163   : > { %4387 = vmatmul.mubr.msk.bf16.gmra.mrb[28].mxu0 %vm969_vm0, %v921_v63 }
 0x164   : > { %1407 = vmatprep.mubr.bf16.mxu0 %v5376_v31 }
 0x16b   : > { %4388 = vmatmul.mubr.msk.bf16.gmra.mrb[32].mxu0 %vm969_vm0, %v922_v14 }
 0x16c   : > { %1417 = vmatprep.mubr.bf16.mxu0 %v5376_v31 }
 0x173   : > { %4389 = vmatmul.mubr.msk.bf16.gmra.mrb[36].mxu0 %vm969_vm0, %v923_v11 }
 0x174   : > { %1427 = vmatprep.mubr.bf16.mxu0 %v5376_v31 }
 0x17b   : > { %4390 = vmatmul.mubr.msk.bf16.gmra.mrb[40].mxu0 %vm969_vm0, %v924_v26 }
 0x17c   : > { %1437 = vmatprep.mubr.bf16.mxu0 %v5376_v31 }
 0x183   : > { %4391 = vmatmul.mubr.msk.bf16.gmra.mrb[44].mxu0 %vm969_vm0, %v925_v23 }
 0x21e   : > { %v1369_v37 = vpop.f32.mrb[16].mxu0 }
 0x21f   : > { %v1492_v40 = vmul.f32 %v5723_v34, %v1369_v37  ;;  %v1371_v41 = vpop.f32.mrb[17].mxu0 }
 0x220   : > { %v1493_v42 = vmul.f32 %v5726_v35, %v1371_v41  ;;  %v1373_v43 = vpop.f32.mrb[18].mxu0 }
 0x221   : > { %v1537_v45 = vadd.f32 %v5729_v36, %v1492_v40  ;;  %v1494_v46 = vmul.f32 %v5723_v34, %v1373_v43  ;;  %v1375_v47 = vpop.f32.mrb[19].mxu0 }
 0x222   : > { %v1538_v48 = vadd.f32 %v5732_v38, %v1493_v42  ;;  %v1495_v49 = vmul.f32 %v5726_v35, %v1375_v47 }
 0x223   : > { %v1539_v50 = vadd.f32 %v5729_v36, %v1494_v46  ;;  %v1569_v52 = vmax.f32 %v1537_v45, 0.0 }
 0x224   : > { %v1540_v51 = vadd.f32 %v5732_v38, %v1495_v49  ;;  %v1570_v54 = vmax.f32 %v1538_v48, 0.0 }
 0x225   : > { %v1571_v53 = vmax.f32 %v1539_v50, 0.0 }
 0x226   : > { %v1572_v55 = vmax.f32 %v1540_v51, 0.0  ;;  %v1379_v56 = vpop.f32.mrb[20].mxu0 }
 0x227   : > { %v5756_v57 = vpack.c.bf16 %v1571_v53, %v1569_v52  ;;  %v1496_v58 = vmul.f32 %v5723_v34, %v1379_v56  ;;  %v1381_v59 = vpop.f32.mrb[21].mxu0 }
 0x228   : > { %v1497_v60 = vmul.f32 %v5726_v35, %v1381_v59  ;;  %v1383_v61 = vpop.f32.mrb[22].mxu0  ;;  %v5760_v62 = vpack.c.bf16 %v1572_v55, %v1570_v54 }
 0x229   : > { %v1541_v63 = vadd.f32 %v5729_v36, %v1496_v58  ;;  %v1498_v0 = vmul.f32 %v5723_v34, %v1383_v61  ;;  %v1385_v1 = vpop.f32.mrb[23].mxu0 }
 0x22a   : > { %v1542_v2 = vadd.f32 %v5732_v38, %v1497_v60  ;;  %v1499_v3 = vmul.f32 %v5726_v35, %v1385_v1  ;;  %1649 = vmatprep.subr.bf16.mxu1 %v5760_v62 }
 0x22b   : > { %v1543_v4 = vadd.f32 %v5729_v36, %v1498_v0  ;;  %1650 = vmatpush1.bf16.msra.mxu1 %v5756_v57  ;;  %v1573_v6 = vmax.f32 %v1541_v63, 0.0 }
 0x22c   : > { %v1544_v5 = vadd.f32 %v5732_v38, %v1499_v3  ;;  %v1574_v8 = vmax.f32 %v1542_v2, 0.0 }
 0x22d   : > { %v1575_v7 = vmax.f32 %v1543_v4, 0.0 }
 0x22e   : > { %v1576_v9 = vmax.f32 %v1544_v5, 0.0  ;;  %v1389_v10 = vpop.f32.mrb[24].mxu0 }
 0x22f   : > { %v5770_v11 = vpack.c.bf16 %v1575_v7, %v1573_v6  ;;  %v1500_v12 = vmul.f32 %v5723_v34, %v1389_v10  ;;  %v1391_v13 = vpop.f32.mrb[25].mxu0 }
 0x230   : > { %v1501_v14 = vmul.f32 %v5726_v35, %v1391_v13  ;;  %v1393_v15 = vpop.f32.mrb[26].mxu0  ;;  %v5774_v16 = vpack.c.bf16 %v1576_v9, %v1574_v8 }
 0x231   : > { %v1545_v17 = vadd.f32 %v5729_v36, %v1500_v12  ;;  %v1502_v18 = vmul.f32 %v5723_v34, %v1393_v15  ;;  %v1395_v19 = vpop.f32.mrb[27].mxu0 }
 0x232   : > { %v1546_v20 = vadd.f32 %v5732_v38, %v1501_v14  ;;  %v1503_v21 = vmul.f32 %v5726_v35, %v1395_v19  ;;  %1651 = vmatprep.subr.bf16.mxu1 %v5774_v16 }
 0x233   : > { %v1547_v22 = vadd.f32 %v5729_v36, %v1502_v18  ;;  %1652 = vmatpush1.bf16.msra.mxu1 %v5770_v11  ;;  %v1577_v24 = vmax.f32 %v1545_v17, 0.0 }
 0x234   : > { %v1548_v23 = vadd.f32 %v5732_v38, %v1503_v21  ;;  %v1578_v26 = vmax.f32 %v1546_v20, 0.0 }
 0x235   : > { %v1579_v25 = vmax.f32 %v1547_v22, 0.0 }
 0x236   : > { %v1580_v27 = vmax.f32 %v1548_v23, 0.0  ;;  %v1399_v28 = vpop.f32.mrb[28].mxu0 }
 0x237   : > { %v5784_v30 = vpack.c.bf16 %v1579_v25, %v1577_v24  ;;  %v1504_v33 = vmul.f32 %v5723_v34, %v1399_v28  ;;  %v1401_v37 = vpop.f32.mrb[29].mxu0 }
 0x238   : > { %v1505_v40 = vmul.f32 %v5726_v35, %v1401_v37  ;;  %v1403_v41 = vpop.f32.mrb[30].mxu0  ;;  %v5788_v42 = vpack.c.bf16 %v1580_v27, %v1578_v26 }
 0x239   : > { %v1549_v43 = vadd.f32 %v5729_v36, %v1504_v33  ;;  %v1506_v45 = vmul.f32 %v5723_v34, %v1403_v41  ;;  %v1405_v46 = vpop.f32.mrb[31].mxu0 }
 0x23a   : > { %v1550_v47 = vadd.f32 %v5732_v38, %v1505_v40  ;;  %v1507_v48 = vmul.f32 %v5726_v35, %v1405_v46  ;;  %1653 = vmatprep.subr.bf16.mxu1 %v5788_v42 }
 0x23b   : > { %v1551_v49 = vadd.f32 %v5729_v36, %v1506_v45  ;;  %1654 = vmatpush1.bf16.msra.mxu1 %v5784_v30  ;;  %v1581_v51 = vmax.f32 %v1549_v43, 0.0 }
 0x23c   : > { %v1552_v50 = vadd.f32 %v5732_v38, %v1507_v48  ;;  %v1582_v53 = vmax.f32 %v1550_v47, 0.0 }
 0x23d   : > { %v1583_v52 = vmax.f32 %v1551_v49, 0.0 }
 0x23e   : > { %v1584_v54 = vmax.f32 %v1552_v50, 0.0  ;;  %v1409_v55 = vpop.f32.mrb[32].mxu0 }
 0x23f   : > { %v5798_v56 = vpack.c.bf16 %v1583_v52, %v1581_v51  ;;  %v1508_v58 = vmul.f32 %v5723_v34, %v1409_v55  ;;  %v1411_v59 = vpop.f32.mrb[33].mxu0 }
 0x240   : > { %v1509_v60 = vmul.f32 %v5726_v35, %v1411_v59  ;;  %v1413_v61 = vpop.f32.mrb[34].mxu0  ;;  %v5802_v63 = vpack.c.bf16 %v1584_v54, %v1582_v53 }
 0x241   : > { %v1553_v0 = vadd.f32 %v5729_v36, %v1508_v58  ;;  %v1510_v1 = vmul.f32 %v5723_v34, %v1413_v61  ;;  %v1415_v2 = vpop.f32.mrb[35].mxu0 }
 0x242   : > { %v1554_v3 = vadd.f32 %v5732_v38, %v1509_v60  ;;  %v1511_v4 = vmul.f32 %v5726_v35, %v1415_v2  ;;  %1655 = vmatprep.subr.bf16.mxu1 %v5802_v63 }
 0x243   : > { %v1555_v5 = vadd.f32 %v5729_v36, %v1510_v1  ;;  %1656 = vmatpush1.bf16.msra.mxu1 %v5798_v56  ;;  %v1585_v7 = vmax.f32 %v1553_v0, 0.0 }
 0x244   : > { %v1556_v6 = vadd.f32 %v5732_v38, %v1511_v4  ;;  %v1586_v9 = vmax.f32 %v1554_v3, 0.0 }
 0x245   : > { %v1587_v8 = vmax.f32 %v1555_v5, 0.0 }
 0x246   : > { %v1588_v10 = vmax.f32 %v1556_v6, 0.0  ;;  %v1419_v12 = vpop.f32.mrb[36].mxu0 }
 0x247   : > { %v5812_v13 = vpack.c.bf16 %v1587_v8, %v1585_v7  ;;  %v1512_v14 = vmul.f32 %v5723_v34, %v1419_v12  ;;  %v1421_v15 = vpop.f32.mrb[37].mxu0 }
 0x248   : > { %v1513_v17 = vmul.f32 %v5726_v35, %v1421_v15  ;;  %v1423_v18 = vpop.f32.mrb[38].mxu0  ;;  %v5816_v19 = vpack.c.bf16 %v1588_v10, %v1586_v9 }
 0x249   : > { %v1557_v20 = vadd.f32 %v5729_v36, %v1512_v14  ;;  %v1514_v21 = vmul.f32 %v5723_v34, %v1423_v18  ;;  %v1425_v22 = vpop.f32.mrb[39].mxu0 }
 0x24a   : > { %v1558_v23 = vadd.f32 %v5732_v38, %v1513_v17  ;;  %v1515_v24 = vmul.f32 %v5726_v35, %v1425_v22  ;;  %1657 = vmatprep.subr.bf16.mxu1 %v5816_v19 }
 0x24b   : > { %v1559_v25 = vadd.f32 %v5729_v36, %v1514_v21  ;;  %1658 = vmatpush1.bf16.msra.mxu1 %v5812_v13  ;;  %v1589_v27 = vmax.f32 %v1557_v20, 0.0 }
 0x24c   : > { %v1560_v26 = vadd.f32 %v5732_v38, %v1515_v24  ;;  %v1590_v33 = vmax.f32 %v1558_v23, 0.0  ;;  %v5184_v24 = vld [vmem:[%s6734_s10 + $0x20] sm:$0xff]  }
 0x24d   : > { %v1591_v28 = vmax.f32 %v1559_v25, 0.0  ;;  %v5924_v25 = vld [vmem:[%s6734_s10 + $0x80] sm:$0xff]  }
 0x24e   : > { %v1592_v37 = vmax.f32 %v1560_v26, 0.0  ;;  %v1429_v40 = vpop.f32.mrb[40].mxu0  ;;  %v5186_v26 = vld [vmem:[%s6734_s10 + $0x28] sm:$0xff]  }
 0x24f   : > { %v5826_v41 = vpack.c.bf16 %v1591_v28, %v1589_v27  ;;  %v1516_v43 = vmul.f32 %v5723_v34, %v1429_v40  ;;  %v1431_v45 = vpop.f32.mrb[41].mxu0  ;;  %v5935_v27 = vld [vmem:[%s6734_s10 + $0x88] sm:$0xff]   ;;  %v5188_v28 = vld [vmem:[%s6734_s10 + $0x30] sm:$0xff]   ;;  %v5957_v40 = vld [vmem:[%s6734_s10 + $0x98] sm:$0xff]  }
 0x250   : > { %v1517_v46 = vmul.f32 %v5726_v35, %v1431_v45  ;;  %v1433_v47 = vpop.f32.mrb[42].mxu0  ;;  %v1612_v48 = vpack.c.bf16 %v1592_v37, %v1590_v33  ;;  %v5946_v33 = vld [vmem:[%s6734_s10 + $0x90] sm:$0xff]   ;;  %v5190_v37 = vld [vmem:[%s6734_s10 + $0x38] sm:$0xff]   ;;  %v5194_v45 = vld [vmem:[%s6734_s10 + $0x48] sm:$0xff]  }
 0x251   : > { %v1561_v49 = vadd.f32 %v5729_v36, %v1516_v43  ;;  %v1518_v50 = vmul.f32 %v5723_v34, %v1433_v47  ;;  %v1435_v51 = vpop.f32.mrb[43].mxu0  ;;  %v5968_v43 = vld [vmem:[%s6734_s10 + $0xa0] sm:$0xff]   ;;  %v5196_v47 = vld [vmem:[%s6734_s10 + $0x50] sm:$0xff]  }
 0x252   : > { %v1562_v52 = vadd.f32 %v5732_v38, %v1517_v46  ;;  %v1519_v53 = vmul.f32 %v5726_v35, %v1435_v51  ;;  %1659 = vmatprep.subr.bf16.mxu1 %v1612_v48  ;;  %v5979_v46 = vld [vmem:[%s6734_s10 + $0xa8] sm:$0xff]  }
 0x253   : > { %v1563_v54 = vadd.f32 %v5729_v36, %v1518_v50  ;;  %1660 = vmatpush1.bf16.msra.mxu1 %v5826_v41  ;;  %v1593_v58 = vmax.f32 %v1561_v49, 0.0  ;;  %v5198_v49 = vld [vmem:[%s6734_s10 + $0x58] sm:$0xff]   ;;  %v5202_v51 = vld [vmem:[%s6729_s5 + $0x64] ss:$8 sps:$4 sm:$0xff]  }
 0x254   : > { %v1564_v55 = vadd.f32 %v5732_v38, %v1519_v53  ;;  %v1594_v60 = vmax.f32 %v1562_v52, 0.0  ;;  %v6001_v50 = vld [vmem:[%s6734_s10 + $0xb8] sm:$0xff]  }
 0x255   : > { %v1595_v59 = vmax.f32 %v1563_v54, 0.0 }
 0x256   : > { %v1596_v61 = vmax.f32 %v1564_v55, 0.0  ;;  %v1439_v0 = vpop.f32.mrb[44].mxu0 }
 0x257   : > { %v1613_v1 = vpack.c.bf16 %v1595_v59, %v1593_v58  ;;  %v1520_v2 = vmul.f32 %v5723_v34, %v1439_v0  ;;  %v1441_v3 = vpop.f32.mrb[45].mxu0 }
 0x258   : > { %v1521_v4 = vmul.f32 %v5726_v35, %v1441_v3  ;;  %v1443_v5 = vpop.f32.mrb[46].mxu0  ;;  %v1614_v6 = vpack.c.bf16 %v1596_v61, %v1594_v60 }
 0x259   : > { %v1565_v7 = vadd.f32 %v5729_v36, %v1520_v2  ;;  %v1522_v8 = vmul.f32 %v5723_v34, %v1443_v5  ;;  %v1445_v9 = vpop.f32.mrb[47].mxu0  ;;  %v5168_v34 = vld [vmem:[%s6733_s9] sm:$0xff]  }
 0x25a   : > { %v1566_v10 = vadd.f32 %v5732_v38, %v1521_v4  ;;  %v1523_v12 = vmul.f32 %v5726_v35, %v1445_v9  ;;  %1661 = vmatprep.subr.bf16.mxu1 %v1614_v6  ;;  %v5169_v35 = vld [vmem:[%s6733_s9 + $0x8] sm:$0xff]  }
 0x25b   : > { %v1567_v14 = vadd.f32 %v5729_v36, %v1522_v8  ;;  %1662 = vmatpush1.bf16.msra.mxu1 %v1613_v1  ;;  %v1597_v17 = vmax.f32 %v1565_v7, 0.0  ;;  %v5170_v36 = vld [vmem:[%s6733_s9 + $0x10] sm:$0xff]  }
 0x25c   : > { %v1568_v15 = vadd.f32 %v5732_v38, %v1523_v12  ;;  %v1598_v20 = vmax.f32 %v1566_v10, 0.0  ;;  %v5171_v38 = vld [vmem:[%s6733_s9 + $0x18] sm:$0xff]  }
 0x25d   : > { %v1599_v18 = vmax.f32 %v1567_v14, 0.0 }
 0x25e   : > { %v1600_v21 = vmax.f32 %v1568_v15, 0.0 }
 0x25f   : > { %v1615_v22 = vpack.c.bf16 %v1599_v18, %v1597_v17 }
 0x260   : > { %v1616_v23 = vpack.c.bf16 %v1600_v21, %v1598_v20 }
 0x262   : > { %1663 = vmatprep.subr.bf16.mxu1 %v1616_v23 }
 0x263   : > { %1664 = vmatpush1.bf16.msra.mxu1 %v1615_v22 }
 0x264   : > { %1755 = vmatprep.subr.bf16.mxu1 %v5760_v62  ;;  %v5176_v62 = vld [vmem:[%s6734_s10] sm:$0xff]  }
 0x266   : > { %1682 = vmatmul.mubr.bf16.vlgmr.msra.gmra.mrb[16].mxu1 %v5168_v34 }
 0x267   : > { %1756 = vmatpush1.bf16.msra.mxu1 %v5756_v57  ;;  %1691 = vmatprep.mubr.bf16.mxu1 %v5376_v31  ;;  %v5172_v57 = vld [vmem:[%s6733_s9 + $0x20] sm:$0xff]  }
 0x268   : > { %1757 = vmatprep.subr.bf16.mxu1 %v5774_v16  ;;  %v5173_v16 = vld [vmem:[%s6733_s9 + $0x28] sm:$0xff]  }
 0x26b   : > { %1758 = vmatpush1.bf16.msra.mxu1 %v5770_v11  ;;  %v5178_v11 = vld [vmem:[%s6734_s10 + $0x8] sm:$0xff]  }
 0x26c   : > { %1759 = vmatprep.subr.bf16.mxu1 %v5788_v42  ;;  %v5175_v42 = vld [vmem:[%s6733_s9 + $0x38] sm:$0xff]  }
 0x26e   : > { %1692 = vmatmul.mubr.bf16.gmra.mrb[20].mxu1 %v5169_v35 }
 0x26f   : > { %1760 = vmatpush1.bf16.msra.mxu1 %v5784_v30  ;;  %1701 = vmatprep.mubr.bf16.mxu1 %v5376_v31  ;;  %v5174_v30 = vld [vmem:[%s6733_s9 + $0x30] sm:$0xff]  }
 0x270   : > { %1761 = vmatprep.subr.bf16.mxu1 %v5802_v63  ;;  %v5902_v63 = vld [vmem:[%s6734_s10 + $0x70] sm:$0xff]  }
 0x271   : > { %2128 = vmatpush1.bf16.msra.mxu0 %v5902_v63 }
 0x272   : > { %2129 = vmatprep.subr.bf16.mxu0 %v5376_v31 }
 0x273   : > { %1762 = vmatpush1.bf16.msra.mxu1 %v5798_v56  ;;  %v5180_v56 = vld [vmem:[%s6734_s10 + $0x10] sm:$0xff]  }
 0x274   : > { %1763 = vmatprep.subr.bf16.mxu1 %v5816_v19  ;;  %v5913_v19 = vld [vmem:[%s6734_s10 + $0x78] sm:$0xff]  }
 0x275   : > { %2130 = vmatpush1.bf16.msra.mxu0 %v5913_v19 }
 0x276   : > { %1702 = vmatmul.mubr.bf16.gmra.mrb[24].mxu1 %v5170_v36  ;;  %2131 = vmatprep.subr.bf16.mxu0 %v5376_v31 }
 0x277   : > { %1764 = vmatpush1.bf16.msra.mxu1 %v5812_v13  ;;  %1711 = vmatprep.mubr.bf16.mxu1 %v5376_v31  ;;  %v5182_v13 = vld [vmem:[%s6734_s10 + $0x18] sm:$0xff]  }
 0x278   : > { %1765 = vmatprep.subr.bf16.mxu1 %v1612_v48  ;;  %v5990_v48 = vld [vmem:[%s6734_s10 + $0xb0] sm:$0xff]  }
 0x279   : > { %2132 = vmatpush1.bf16.msra.mxu0 %v5924_v25 }
 0x27a   : > { %2133 = vmatprep.subr.bf16.mxu0 %v5376_v31 }
 0x27b   : > { %1766 = vmatpush1.bf16.msra.mxu1 %v5826_v41  ;;  %v5192_v41 = vld [vmem:[%s6734_s10 + $0x40] sm:$0xff]  }
 0x27c   : > { %1767 = vmatprep.subr.bf16.mxu1 %v1614_v6 }
 0x27d   : > { %2134 = vmatpush1.bf16.msra.mxu0 %v5935_v27 }
 0x27e   : > { %1712 = vmatmul.mubr.bf16.gmra.mrb[28].mxu1 %v5171_v38  ;;  %2135 = vmatprep.subr.bf16.mxu0 %v5376_v31 }
 0x27f   : > { %1768 = vmatpush1.bf16.msra.mxu1 %v1613_v1  ;;  %1787 = vmatprep.mubr.bf16.mxu1 %v5376_v31 }
 0x280   : > { %1769 = vmatprep.subr.bf16.mxu1 %v1616_v23  ;;  %v5205_v23 = vld [vmem:[%s6729_s5 + $0x74] ss:$8 sps:$4 sm:$0xff]  }
 0x281   : > { %2136 = vmatpush1.bf16.msra.mxu0 %v5946_v33 }
 0x282   : > { %2137 = vmatprep.subr.bf16.mxu0 %v5376_v31 }
 0x283   : > { %1770 = vmatpush1.bf16.msra.mxu1 %v1615_v22  ;;  %v5200_v22 = vld [vmem:[%s6729_s5 + $0x60] ss:$8 sps:$4 sm:$0xff]  }
 0x284   : > { %1961 = vmatprep.subr.bf16.mxu1 %v5376_v31 }
 0x285   : > { %2138 = vmatpush1.bf16.msra.mxu0 %v5957_v40 }
 0x286   : > { %1788 = vmatmul.mubr.bf16.vlgmr.msra.gmra.mrb[32].mxu1 %v5172_v57  ;;  %2139 = vmatprep.subr.bf16.mxu0 %v5376_v31 }
 0x287   : > { %1797 = vmatprep.mubr.bf16.mxu1 %v5376_v31  ;;  %1962 = vmatpush1.bf16.msra.mxu1 %v5176_v62  ;;  %v5203_v62 = vld [vmem:[%s6729_s5 + $0x70] ss:$8 sps:$4 sm:$0xff]  }
 0x288   : > { %1963 = vmatprep.subr.bf16.mxu1 %v5376_v31 }
 0x289   : > { %2140 = vmatpush1.bf16.msra.mxu0 %v5968_v43 }
 0x28a   : > { %2141 = vmatprep.subr.bf16.mxu0 %v5376_v31 }
 0x28b   : > { %1964 = vmatpush1.bf16.msra.mxu1 %v5178_v11 }
 0x28c   : > { %1965 = vmatprep.subr.bf16.mxu1 %v5376_v31 }
 0x28d   : > { %2142 = vmatpush1.bf16.msra.mxu0 %v5979_v46 }
 0x28e   : > { %1798 = vmatmul.mubr.bf16.gmra.mrb[36].mxu1 %v5173_v16  ;;  %2143 = vmatprep.subr.bf16.mxu0 %v5376_v31 }
 0x28f   : > { %1807 = vmatprep.mubr.bf16.mxu1 %v5376_v31  ;;  %1966 = vmatpush1.bf16.msra.mxu1 %v5180_v56 }
 0x290   : > { %1967 = vmatprep.subr.bf16.mxu1 %v5376_v31 }
 0x291   : > { %2144 = vmatpush1.bf16.msra.mxu0 %v5990_v48 }
 0x292   : > { %2145 = vmatprep.subr.bf16.mxu0 %v5376_v31 }
 0x293   : > { %1968 = vmatpush1.bf16.msra.mxu1 %v5182_v13 }
 0x294   : > { %1969 = vmatprep.subr.bf16.mxu1 %v5376_v31 }
 0x295   : > { %2146 = vmatpush1.bf16.msra.mxu0 %v6001_v50 }
 0x296   : > { %1808 = vmatmul.mubr.bf16.gmra.mrb[40].mxu1 %v5174_v30  ;;  %2517 = vmatprep.subr.bf16.mxu0 %v5202_v51  ;;  %v5208_v30 = vld [vmem:[%s6729_s5 + $0x84] ss:$8 sps:$4 sm:$0xff]  }
 0x297   : > { %1817 = vmatprep.mubr.bf16.mxu1 %v5376_v31  ;;  %1970 = vmatpush1.bf16.msra.mxu1 %v5184_v24  ;;  %v5211_v24 = vld [vmem:[%s6729_s5 + $0x94] ss:$8 sps:$4 sm:$0xff]   ;;  %v5214_v51 = vld [vmem:[%s6729_s5 + $0xa4] ss:$8 sps:$4 sm:$0xff]  }
 0x298   : > { %1971 = vmatprep.subr.bf16.mxu1 %v5376_v31 }
 0x29b   : > { %1972 = vmatpush1.bf16.msra.mxu1 %v5186_v26 }
 0x29c   : > { %1973 = vmatprep.subr.bf16.mxu1 %v5376_v31 }
 0x29e   : > { %1818 = vmatmul.mubr.bf16.gmra.mrb[44].mxu1 %v5175_v42 }
 0x29f   : > { %1974 = vmatpush1.bf16.msra.mxu1 %v5188_v28 }
 0x2a0   : > { %1975 = vmatprep.subr.bf16.mxu1 %v5376_v31 }
 0x2a3   : > { %1976 = vmatpush1.bf16.msra.mxu1 %v5190_v37 }
 0x2a4   : > { %1977 = vmatprep.subr.bf16.mxu1 %v5376_v31 }
 0x2a7   : > { %1978 = vmatpush1.bf16.msra.mxu1 %v5192_v41 }
 0x2a8   : > { %1979 = vmatprep.subr.bf16.mxu1 %v5376_v31 }
 0x2ab   : > { %1980 = vmatpush1.bf16.msra.mxu1 %v5194_v45  ;;  %v5209_v45 = vld [vmem:[%s6729_s5 + $0x90] ss:$8 sps:$4 sm:$0xff]  }
 0x2ac   : > { %1981 = vmatprep.subr.bf16.mxu1 %v5376_v31 }
 0x2af   : > { %1982 = vmatpush1.bf16.msra.mxu1 %v5196_v47 }
 0x2b0   : > { %1983 = vmatprep.subr.bf16.mxu1 %v5376_v31 }
 0x2b3   : > { %1984 = vmatpush1.bf16.msra.mxu1 %v5198_v49 }
 0x2b4   : > { %4953 = vmatprep.subr.bf16.mxu1 %v5376_v31 }
 0x339   : > { %v1683_v52 = vpop.f32.mrb[16].mxu1 }
 0x33a   : > { %v1685_v53 = vpop.f32.mrb[17].mxu1 }
 0x33b   : > { %v1687_v54 = vpop.f32.mrb[18].mxu1 }
 0x33c   : > { %v1689_v55 = vpop.f32.mrb[19].mxu1 }
 0x341   : > { %v1693_v58 = vpop.f32.mrb[20].mxu1 }
 0x342   : > { %v1695_v59 = vpop.f32.mrb[21].mxu1 }
 0x343   : > { %v1697_v60 = vpop.f32.mrb[22].mxu1 }
 0x344   : > { %v1699_v61 = vpop.f32.mrb[23].mxu1 }
 0x349   : > { %v6008_v0 = vpop.f32.mrb[24].mxu1 }
 0x34a   : > { %v6010_v1 = vpop.f32.mrb[25].mxu1 }
 0x34b   : > { %v6012_v2 = vpop.f32.mrb[26].mxu1 }
 0x34c   : > { %v6014_v3 = vpop.f32.mrb[27].mxu1 }
 0x351   : > { %v6016_v4 = vpop.f32.mrb[28].mxu1 }
 0x352   : > { %v6018_v5 = vpop.f32.mrb[29].mxu1 }
 0x353   : > { %v6020_v6 = vpop.f32.mrb[30].mxu1 }
 0x354   : > { %v6022_v7 = vpop.f32.mrb[31].mxu1 }
 0x359   : > { %v1789_v8 = vpop.f32.mrb[32].mxu1 }
 0x35a   : > { %v1828_v9 = vmax.f32 %v1683_v52, %v1789_v8  ;;  %v1791_v10 = vpop.f32.mrb[33].mxu1 }
 0x35b   : > { %v1829_v12 = vmax.f32 %v1685_v53, %v1791_v10  ;;  %v1793_v14 = vpop.f32.mrb[34].mxu1 }
 0x35c   : > { %v1830_v15 = vmax.f32 %v1687_v54, %v1793_v14  ;;  %v1795_v17 = vpop.f32.mrb[35].mxu1  ;;  %v5212_v54 = vld [vmem:[%s6729_s5 + $0xa0] ss:$8 sps:$4 sm:$0xff]   ;;  %v5231_v14 = vld [vmem:[%s6729_s5 + $0x14] ss:$8 sps:$4 sm:$0xff]  }
 0x35d   : > { %v1831_v18 = vmax.f32 %v1689_v55, %v1795_v17 }
 0x35e   : > { %v1844_v20 = vpack.c.bf16 %v1830_v15, %v1828_v9 }
 0x35f   : > { %v1845_v21 = vpack.c.bf16 %v1831_v18, %v1829_v12  ;;  %v5226_v12 = vld [vmem:[%s6729_s5] ss:$8 sps:$4 sm:$0xff]  }
 0x361   : > { %v1799_v34 = vpop.f32.mrb[36].mxu1  ;;  %4421 = vmatprep.mubr.msk.bf16.mxu1 %vm1948_vm1, %v1845_v21  ;;  %4461 = vmatprep.mubr.msk.bf16.mxu0 %vm1948_vm1, %v1845_v21 }
 0x362   : > { %v1832_v35 = vmax.f32 %v1693_v58, %v1799_v34  ;;  %v1801_v36 = vpop.f32.mrb[37].mxu1  ;;  %1994 = vmatmul.mubr.bf16.vlgmr.msra.gmra.mrb[48].mxu1 %v1844_v20  ;;  %2156 = vmatmul.mubr.bf16.vlgmr.msra.gmra.mrb[48].mxu0 %v1844_v20 }
 0x363   : > { %v1833_v38 = vmax.f32 %v1695_v59, %v1801_v36  ;;  %4965 = vmatpush1.bf16.msra.mxu1 %v5737_v39  ;;  %v1803_v57 = vpop.f32.mrb[38].mxu1  ;;  %2518 = vmatpush1.bf16.msra.mxu0 %v5200_v22  ;;  %v5206_v39 = vld [vmem:[%s6729_s5 + $0x80] ss:$8 sps:$4 sm:$0xff]   ;;  %v5229_v22 = vld [vmem:[%s6729_s5 + $0x10] ss:$8 sps:$4 sm:$0xff]  }
 0x364   : > { %v1834_v11 = vmax.f32 %v1697_v60, %v1803_v57  ;;  %v1805_v16 = vpop.f32.mrb[39].mxu1  ;;  %4954 = vmatprep.subr.bf16.mxu1 %v5376_v31  ;;  %2519 = vmatprep.subr.bf16.mxu0 %v5205_v23 }
 0x365   : > { %v1835_v42 = vmax.f32 %v1699_v61, %v1805_v16  ;;  %v5237_v16 = vld [vmem:[%s6729_s5 + $0x34] ss:$8 sps:$4 sm:$0xff]  }
 0x366   : > { %v1846_v56 = vpack.c.bf16 %v1834_v11, %v1832_v35  ;;  %v5234_v35 = vld [vmem:[%s6729_s5 + $0x24] ss:$8 sps:$4 sm:$0xff]   ;;  %v5232_v11 = vld [vmem:[%s6729_s5 + $0x20] ss:$8 sps:$4 sm:$0xff]  }
 0x367   : > { %v1847_v13 = vpack.c.bf16 %v1835_v42, %v1833_v38  ;;  %4966 = vmatpush1.bf16.msra.mxu1 %v5745_v44  ;;  %2520 = vmatpush1.bf16.msra.mxu0 %v5203_v62 }
 0x368   : > { %4955 = vmatprep.subr.bf16.mxu1 %v5376_v31  ;;  %2521 = vmatprep.subr.bf16.mxu0 %v5208_v30 }
 0x369   : > { %v1809_v26 = vpop.f32.mrb[40].mxu1  ;;  %4422 = vmatprep.mubr.msk.bf16.mxu1 %vm1948_vm1, %v1847_v13  ;;  %4462 = vmatprep.mubr.msk.bf16.mxu0 %vm1948_vm1, %v1847_v13 }
 0x36a   : > { %v1836_v28 = vmax.f32 %v6008_v0, %v1809_v26  ;;  %v1811_v44 = vpop.f32.mrb[41].mxu1  ;;  %2002 = vmatmul.mubr.bf16.gmra.mrb[52].mxu1 %v1846_v56  ;;  %2164 = vmatmul.mubr.bf16.gmra.mrb[52].mxu0 %v1846_v56  ;;  %v5235_v56 = vld [vmem:[%s6729_s5 + $0x30] ss:$8 sps:$4 sm:$0xff]   ;;  %v5238_v26 = vld [vmem:[%s6729_s5 + $0x40] ss:$8 sps:$4 sm:$0xff]  }
 0x36b   : > { %v1837_v37 = vmax.f32 %v6010_v1, %v1811_v44  ;;  %4967 = vmatpush1.bf16.msra.mxu1 %v5902_v63  ;;  %v1813_v41 = vpop.f32.mrb[42].mxu1  ;;  %2522 = vmatpush1.bf16.msra.mxu0 %v5206_v39  ;;  %v5240_v39 = vld [vmem:[%s6729_s5 + $0x44] ss:$8 sps:$4 sm:$0xff]  }
 0x36c   : > { %v1838_v47 = vmax.f32 %v6012_v2, %v1813_v41  ;;  %v1815_v49 = vpop.f32.mrb[43].mxu1  ;;  %4956 = vmatprep.subr.bf16.mxu1 %v5376_v31  ;;  %2523 = vmatprep.subr.bf16.mxu0 %v5211_v24 }
 0x36d   : > { %v1839_v52 = vmax.f32 %v6014_v3, %v1815_v49  ;;  %2549 = vmatprep.mubr.bf16.mxu0 %v5376_v31 }
 0x36e   : > { %v1848_v63 = vpack.c.bf16 %v1838_v47, %v1836_v28 }
 0x36f   : > { %v1849_v53 = vpack.c.bf16 %v1839_v52, %v1837_v37  ;;  %4968 = vmatpush1.bf16.msra.mxu1 %v5913_v19  ;;  %2524 = vmatpush1.bf16.msra.mxu0 %v5209_v45 }
 0x370   : > { %4957 = vmatprep.subr.bf16.mxu1 %v5376_v31  ;;  %2525 = vmatprep.subr.bf16.mxu0 %v5214_v51 }
 0x371   : > { %v1819_v55 = vpop.f32.mrb[44].mxu1  ;;  %4423 = vmatprep.mubr.msk.bf16.mxu1 %vm1948_vm1, %v1849_v53 }
 0x372   : > { %v1840_v58 = vmax.f32 %v6016_v4, %v1819_v55  ;;  %v1821_v59 = vpop.f32.mrb[45].mxu1  ;;  %2010 = vmatmul.mubr.bf16.gmra.mrb[56].mxu1 %v1848_v63 }
 0x373   : > { %v1841_v60 = vmax.f32 %v6018_v5, %v1821_v59  ;;  %4969 = vmatpush1.bf16.msra.mxu1 %v5924_v25  ;;  %v1823_v19 = vpop.f32.mrb[46].mxu1  ;;  %2526 = vmatpush1.bf16.msra.mxu0 %v5212_v54  ;;  %v5217_v25 = vld [vmem:[%s6729_s5 + $0xb4] ss:$8 sps:$4 sm:$0xff]  }
 0x374   : > { %v1842_v61 = vmax.f32 %v6020_v6, %v1823_v19  ;;  %v1825_v0 = vpop.f32.mrb[47].mxu1  ;;  %4958 = vmatprep.subr.bf16.mxu1 %v5376_v31  ;;  %2527 = vmatprep.subr.bf16.mxu0 %v5217_v25  ;;  %v6180_v25 = vld [vmem:[%s6726_s2 + $0x28] sm:$0xff]  }
 0x375   : > { %v1843_v1 = vmax.f32 %v6022_v7, %v1825_v0  ;;  %v6149_v0 = vld [vmem:[%s6726_s2 + $0x8] sm:$0xff]  }
 0x376   : > { %v1850_v2 = vpack.c.bf16 %v1842_v61, %v1840_v58 }
 0x377   : > { %v1851_v3 = vpack.c.bf16 %v1843_v1, %v1841_v60  ;;  %4970 = vmatpush1.bf16.msra.mxu1 %v5935_v27  ;;  %v5215_v27 = vld [vmem:[%s6729_s5 + $0xb0] ss:$8 sps:$4 sm:$0xff]  }
 0x378   : > { %4959 = vmatprep.subr.bf16.mxu1 %v5376_v31  ;;  %2528 = vmatpush1.bf16.msra.mxu0 %v5215_v27  ;;  %v6154_v1 = vld [vmem:[%s6726_s2 + $0x10] sm:$0xff]  }
 0x379   : > { %4424 = vmatprep.mubr.msk.bf16.mxu1 %vm1948_vm1, %v1851_v3  ;;  %v6185_v27 = vld [vmem:[%s6726_s2 + $0x30] sm:$0xff]  }
 0x37a   : > { %2018 = vmatmul.mubr.bf16.gmra.mrb[60].mxu1 %v1850_v2 }
 0x37b   : > { %4971 = vmatpush1.bf16.msra.mxu1 %v5946_v33  ;;  %4463 = vmatprep.mubr.msk.bf16.mxu1 %vm1948_vm1, %v1849_v53  ;;  %v6100_v33 = vld [vmem:[%s6726_s2] sm:$0xff]  }
 0x37c   : > { %4960 = vmatprep.subr.bf16.mxu1 %v5376_v31 }
 0x37f   : > { %4972 = vmatpush1.bf16.msra.mxu1 %v5957_v40  ;;  %v5228_v40 = vld [vmem:[%s6729_s5 + $0x4] ss:$8 sps:$4 sm:$0xff]  }
 0x380   : > { %4961 = vmatprep.subr.bf16.mxu1 %v5376_v31  ;;  %2662 = vmatprep.subr.bf16.mxu0 %v5228_v40  ;;  %v6194_v40 = vld [vmem:[%s6726_s2 + $0x38] sm:$0xff]  }
 0x383   : > { %4973 = vmatpush1.bf16.msra.mxu1 %v5968_v43 }
 0x384   : > { %4962 = vmatprep.subr.bf16.mxu1 %v5376_v31 }
 0x387   : > { %4974 = vmatpush1.bf16.msra.mxu1 %v5979_v46 }
 0x388   : > { %4963 = vmatprep.subr.bf16.mxu1 %v5376_v31 }
 0x38b   : > { %4975 = vmatpush1.bf16.msra.mxu1 %v5990_v48 }
 0x38c   : > { %4964 = vmatprep.subr.bf16.mxu1 %v5376_v31 }
 0x38f   : > { %4976 = vmatpush1.bf16.msra.mxu1 %v6001_v50 }
 0x392   : > { %2172 = vmatmul.mubr.bf16.vlgmr.msra.gmra.mrb[64].mxu1 %v1848_v63 }
 0x393   : > { %4464 = vmatprep.mubr.msk.bf16.mxu1 %vm1948_vm1, %v1851_v3  ;;  %v6171_v3 = vld [vmem:[%s6726_s2 + $0x20] sm:$0xff]  }
 0x39a   : > { %2180 = vmatmul.mubr.bf16.gmra.mrb[68].mxu1 %v1850_v2  ;;  %v6166_v2 = vld [vmem:[%s6726_s2 + $0x18] sm:$0xff]  }
 0x39b   : > { %4879 = vmatprep.mubr.msk.bf16.mxu1 %vm1948_vm1, %v6100_v33 }
 0x435   : > { %v1995_v43 = vpop.f32.mrb[48].mxu1  ;;  %v2157_v46 = vpop.f32.mrb[48].mxu0 }
 0x436   : > { %v2188_v48 = vmax.f32 %v1995_v43, %v2157_v46  ;;  %v1997_v50 = vpop.f32.mrb[49].mxu1  ;;  %v2159_v4 = vpop.f32.mrb[49].mxu0  ;;  %v5243_v43 = vld [vmem:[%s6729_s5 + $0x54] ss:$8 sps:$4 sm:$0xff]   ;;  %v5241_v46 = vld [vmem:[%s6729_s5 + $0x50] ss:$8 sps:$4 sm:$0xff]  }
 0x437   : > { %v1998_v5 = vpop.f32.mrb[50].mxu1  ;;  %v2160_v6 = vpop.f32.mrb[50].mxu0 }
 0x438   : > { %v2189_v7 = vmax.f32 %v1998_v5, %v2160_v6  ;;  %v2000_v8 = vpop.f32.mrb[51].mxu1  ;;  %v2162_v9 = vpop.f32.mrb[51].mxu0 }
 0x439   : > { %v5244_v8 = vld [vmem:[%s6729_s5 + $0xc0] ss:$8 sps:$4 sm:$0xff]  }
 0x43a   : > { %v6107_v10 = vpack.c.bf16 %v2189_v7, %v2188_v48  ;;  %v5246_v48 = vld [vmem:[%s6729_s5 + $0xc4] ss:$8 sps:$4 sm:$0xff]  }
 0x43c   : > { %4871 = vmatprep.subr.bf16.mxu1 %v6107_v10  ;;  %4513 = vmatmul.mubr.msk.bf16.vlgmr.msra.gmra.mrb[56].mxu0 %vm2504_vm2, %v6107_v10 }
 0x43d   : > { %v2003_v15 = vpop.f32.mrb[52].mxu1  ;;  %v2165_v17 = vpop.f32.mrb[52].mxu0  ;;  %4872 = vmatpush3.bf16.msra.mxu1 %v6107_v10  ;;  %2559 = vmatprep.mubr.bf16.mxu0 %v5376_v31 }
 0x43e   : > { %v2190_v18 = vmax.f32 %v2003_v15, %v2165_v17  ;;  %v2005_v20 = vpop.f32.mrb[53].mxu1  ;;  %v2167_v21 = vpop.f32.mrb[53].mxu0  ;;  %2663 = vmatpush1.bf16.msra.mxu0 %v5226_v12  ;;  %v5247_v12 = vld [vmem:[%s6729_s5 + $0xd0] ss:$8 sps:$4 sm:$0xff]   ;;  %v5252_v15 = vld [vmem:[%s6729_s5 + $0xe4] ss:$8 sps:$4 sm:$0xff]  }
 0x43f   : > { %v2006_v23 = vpop.f32.mrb[54].mxu1  ;;  %v2168_v34 = vpop.f32.mrb[54].mxu0  ;;  %2664 = vmatprep.subr.bf16.mxu0 %v5231_v14 }
 0x440   : > { %v2191_v36 = vmax.f32 %v2006_v23, %v2168_v34  ;;  %v2008_v38 = vpop.f32.mrb[55].mxu1  ;;  %v2170_v57 = vpop.f32.mrb[55].mxu0  ;;  %v5255_v34 = vld [vmem:[%s6729_s5 + $0xf4] ss:$8 sps:$4 sm:$0xff]  }
 0x441   : > { %v5258_v38 = vld [vmem:[%s6729_s5 + $0x104] ss:$8 sps:$4 sm:$0xff]  }
 0x442   : > { %v2197_v62 = vpack.c.bf16 %v2191_v36, %v2190_v18  ;;  %2665 = vmatpush1.bf16.msra.mxu0 %v5229_v22  ;;  %v5250_v22 = vld [vmem:[%s6729_s5 + $0xe0] ss:$8 sps:$4 sm:$0xff]  }
 0x443   : > { %2666 = vmatprep.subr.bf16.mxu0 %v5234_v35  ;;  %v5253_v35 = vld [vmem:[%s6729_s5 + $0xf0] ss:$8 sps:$4 sm:$0xff]  }
 0x444   : > { %4873 = vmatprep.subr.bf16.mxu1 %v2197_v62  ;;  %4514 = vmatmul.mubr.msk.bf16.gmra.mrb[60].mxu0 %vm2504_vm2, %v2197_v62 }
 0x445   : > { %v2011_v30 = vpop.f32.mrb[56].mxu1  ;;  %4874 = vmatpush3.bf16.msra.mxu1 %v2197_v62  ;;  %2569 = vmatprep.mubr.bf16.mxu0 %v5376_v31 }
 0x446   : > { %v2013_v42 = vpop.f32.mrb[57].mxu1  ;;  %2667 = vmatpush1.bf16.msra.mxu0 %v5232_v11  ;;  %v5256_v11 = vld [vmem:[%s6729_s5 + $0x100] ss:$8 sps:$4 sm:$0xff]  }
 0x447   : > { %v2014_v13 = vpop.f32.mrb[58].mxu1  ;;  %2668 = vmatprep.subr.bf16.mxu0 %v5237_v16 }
 0x448   : > { %v2016_v24 = vpop.f32.mrb[59].mxu1 }
 0x44a   : > { %2669 = vmatpush1.bf16.msra.mxu0 %v5235_v56  ;;  %v5261_v56 = vld [vmem:[%s6729_s5 + $0x114] ss:$8 sps:$4 sm:$0xff]  }
 0x44b   : > { %2670 = vmatprep.subr.bf16.mxu0 %v5240_v39 }
 0x44d   : > { %v2019_v28 = vpop.f32.mrb[60].mxu1 }
 0x44e   : > { %v2021_v44 = vpop.f32.mrb[61].mxu1  ;;  %2671 = vmatpush1.bf16.msra.mxu0 %v5238_v26 }
 0x44f   : > { %v2022_v37 = vpop.f32.mrb[62].mxu1  ;;  %2672 = vmatprep.subr.bf16.mxu0 %v5243_v43 }
 0x450   : > { %v2024_v41 = vpop.f32.mrb[63].mxu1 }
 0x451   : > { %v2909_v41 = vld [vmem:[%s6730_s6] ss:$2 sm:$0x3] }
 0x452   : > { %2673 = vmatpush1.bf16.msra.mxu0 %v5241_v46 }
 0x453   : > { %2820 = vmatprep.subr.bf16.mxu0 %v5246_v48 }
 0x465   : > { %v2173_v45 = vpop.f32.mrb[64].mxu1 }
 0x466   : > { %v2192_v47 = vmax.f32 %v2011_v30, %v2173_v45  ;;  %v2175_v49 = vpop.f32.mrb[65].mxu1  ;;  %v4561_v45 = vld [vmem:[%s6730_s6 + $0x1] ss:$2 sm:$0x3] }
 0x467   : > { %v2176_v51 = vpop.f32.mrb[66].mxu1  ;;  %v6266_v49 = vrot.slane %v2909_v41, %v5717_v32 }
 0x468   : > { %v2193_v52 = vmax.f32 %v2014_v13, %v2176_v51  ;;  %v2178_v63 = vpop.f32.mrb[67].mxu1  ;;  %v5259_v13 = vld [vmem:[%s6729_s5 + $0x110] ss:$8 sps:$4 sm:$0xff]   ;;  %v6269_v51 = vrot.slane %v4561_v45, %v5712_v29 }
 0x469   : > { %v6272_v63 = vrot.slane %v4561_v45, %v5717_v32 }
 0x46a   : > { %v2198_v53 = vpack.c.bf16 %v2193_v52, %v2192_v47  ;;  %v6263_v47 = vrot.slane %v2909_v41, %v5712_v29 }
 0x46c   : > { %4875 = vmatprep.subr.bf16.mxu1 %v2198_v53  ;;  %4515 = vmatmul.mubr.msk.bf16.gmra.mrb[64].mxu0 %vm2504_vm2, %v2198_v53 }
 0x46d   : > { %v2181_v54 = vpop.f32.mrb[68].mxu1  ;;  %4876 = vmatpush3.bf16.msra.mxu1 %v2198_v53  ;;  %2579 = vmatprep.mubr.bf16.mxu0 %v5376_v31 }
 0x46e   : > { %v2194_v55 = vmax.f32 %v2019_v28, %v2181_v54  ;;  %v2183_v58 = vpop.f32.mrb[69].mxu1 }
 0x46f   : > { %v2184_v59 = vpop.f32.mrb[70].mxu1 }
 0x470   : > { %v2195_v60 = vmax.f32 %v2022_v37, %v2184_v59  ;;  %v2186_v19 = vpop.f32.mrb[71].mxu1 }
 0x472   : > { %v2199_v61 = vpack.c.bf16 %v2195_v60, %v2194_v55 }
 0x474   : > { %4877 = vmatprep.subr.bf16.mxu1 %v2199_v61  ;;  %4516 = vmatmul.mubr.msk.bf16.gmra.mrb[68].mxu0 %vm2504_vm2, %v2199_v61 }
 0x475   : > { %4878 = vmatpush3.bf16.msra.mxu1 %v2199_v61  ;;  %2694 = vmatprep.mubr.bf16.mxu0 %v5376_v31 }
 0x476   : > { %4887 = vmatprep.subr.bf16.mxu1 %v6107_v10 }
 0x478   : > { %4880 = vmatmul.mubr.msk.bf16.vlgmr.msra.gmra.mrb[72].mxu1 %vm1948_vm1, %v6149_v0 }
 0x479   : > { %4888 = vmatpush3.bf16.msra.mxu1 %v6107_v10  ;;  %4883 = vmatprep.mubr.msk.bf16.mxu1 %vm1948_vm1, %v6154_v1  ;;  %v5249_v10 = vld [vmem:[%s6729_s5 + $0xd4] ss:$8 sps:$4 sm:$0xff]  }
 0x47a   : > { %4889 = vmatprep.subr.bf16.mxu1 %v2197_v62 }
 0x47d   : > { %4890 = vmatpush3.bf16.msra.mxu1 %v2197_v62 }
 0x47e   : > { %4891 = vmatprep.subr.bf16.mxu1 %v2198_v53 }
 0x480   : > { %4884 = vmatmul.mubr.msk.bf16.gmra.mrb[76].mxu1 %vm1948_vm1, %v6166_v2 }
 0x481   : > { %4892 = vmatpush3.bf16.msra.mxu1 %v2198_v53  ;;  %4895 = vmatprep.mubr.msk.bf16.mxu1 %vm1948_vm1, %v6171_v3 }
 0x482   : > { %4893 = vmatprep.subr.bf16.mxu1 %v2199_v61 }
 0x485   : > { %4894 = vmatpush3.bf16.msra.mxu1 %v2199_v61 }
 0x488   : > { %4896 = vmatmul.mubr.msk.bf16.vlgmr.msra.gmra.mrb[80].mxu1 %vm1948_vm1, %v6180_v25 }
 0x489   : > { %4899 = vmatprep.mubr.msk.bf16.mxu1 %vm1948_vm1, %v6185_v27 }
 0x490   : > { %4900 = vmatmul.mubr.msk.bf16.gmra.mrb[84].mxu1 %vm1948_vm1, %v6194_v40 }
 0x491   : > { %3022 = vmatprep.mubr.bf16.mxu1 %v5376_v31 }
 0x54b   : > { %v4881_v50 = vpop.f32.mrb[72].mxu1 }
 0x54c   : > { %v2274_v4 = vpop.f32.mrb[73].mxu1 }
 0x54d   : > { %v4882_v5 = vpop.f32.mrb[74].mxu1 }
 0x54e   : > { %v2306_v6 = vpack.c.bf16 %v4882_v5, %v4881_v50  ;;  %v2277_v7 = vpop.f32.mrb[75].mxu1 }
 0x54f   : > { %v2305_v9 = vpack.c.bf16 %v2277_v7, %v2274_v4 }
 0x551   : > { %4529 = vmatmul.mubr.msk.bf16.vlgmr.msra.gmra.mrb[56].mxu0 %vm2504_vm2, %v2305_v9 }
 0x552   : > { %2821 = vmatpush1.bf16.msra.mxu0 %v5244_v8  ;;  %2704 = vmatprep.mubr.bf16.mxu0 %v5376_v31 }
 0x553   : > { %v4885_v14 = vpop.f32.mrb[76].mxu1  ;;  %2822 = vmatprep.subr.bf16.mxu0 %v5249_v10 }
 0x554   : > { %v2290_v17 = vpop.f32.mrb[77].mxu1 }
 0x555   : > { %v4886_v18 = vpop.f32.mrb[78].mxu1 }
 0x556   : > { %v2308_v20 = vpack.c.bf16 %v4886_v18, %v4885_v14  ;;  %v2293_v21 = vpop.f32.mrb[79].mxu1  ;;  %2823 = vmatpush1.bf16.msra.mxu0 %v5247_v12 }
 0x557   : > { %v2307_v23 = vpack.c.bf16 %v2293_v21, %v2290_v17  ;;  %2824 = vmatprep.subr.bf16.mxu0 %v5252_v15 }
 0x559   : > { %4530 = vmatmul.mubr.msk.bf16.gmra.mrb[60].mxu0 %vm2504_vm2, %v2306_v6 }
 0x55a   : > { %2714 = vmatprep.mubr.bf16.mxu0 %v5376_v31  ;;  %2825 = vmatpush1.bf16.msra.mxu0 %v5250_v22 }
 0x55b   : > { %2826 = vmatprep.subr.bf16.mxu0 %v5255_v34  ;;  %v4897_v36 = vpop.f32.mrb[80].mxu1 }
 0x55c   : > { %v2384_v57 = vpop.f32.mrb[81].mxu1 }
 0x55d   : > { %v4898_v62 = vpop.f32.mrb[82].mxu1 }
 0x55e   : > { %2827 = vmatpush1.bf16.msra.mxu0 %v5253_v35  ;;  %v2416_v16 = vpack.c.bf16 %v4898_v62, %v4897_v36  ;;  %v2387_v30 = vpop.f32.mrb[83].mxu1 }
 0x55f   : > { %2828 = vmatprep.subr.bf16.mxu0 %v5258_v38  ;;  %v2415_v42 = vpack.c.bf16 %v2387_v30, %v2384_v57 }
 0x561   : > { %4531 = vmatmul.mubr.msk.bf16.gmra.mrb[64].mxu0 %vm2504_vm2, %v2307_v23 }
 0x562   : > { %2724 = vmatprep.mubr.bf16.mxu0 %v5376_v31  ;;  %2829 = vmatpush1.bf16.msra.mxu0 %v5256_v11 }
 0x563   : > { %2830 = vmatprep.subr.bf16.mxu0 %v5261_v56  ;;  %v4901_v39 = vpop.f32.mrb[84].mxu1 }
 0x564   : > { %v2400_v24 = vpop.f32.mrb[85].mxu1 }
 0x565   : > { %v4902_v26 = vpop.f32.mrb[86].mxu1 }
 0x566   : > { %2831 = vmatpush1.bf16.msra.mxu0 %v5259_v13  ;;  %v2418_v28 = vpack.c.bf16 %v4902_v26, %v4901_v39  ;;  %v2403_v44 = vpop.f32.mrb[87].mxu1 }
 0x567   : > { %v2417_v37 = vpack.c.bf16 %v2403_v44, %v2400_v24 }
 0x569   : > { %4532 = vmatmul.mubr.msk.bf16.gmra.mrb[68].mxu0 %vm2504_vm2, %v2308_v20 }
 0x56a   : > { %2852 = vmatprep.mubr.bf16.mxu0 %v5376_v31 }
 0x571   : > { %4557 = vmatmul.mubr.msk.bf16.vlgmr.msra.gmra.mrb[56].mxu0 %vm2504_vm2, %v2415_v42 }
 0x572   : > { %2862 = vmatprep.mubr.bf16.mxu0 %v5376_v31 }
 0x579   : > { %4558 = vmatmul.mubr.msk.bf16.gmra.mrb[60].mxu0 %vm2504_vm2, %v2416_v16 }
 0x57a   : > { %2872 = vmatprep.mubr.bf16.mxu0 %v5376_v31 }
 0x581   : > { %4559 = vmatmul.mubr.msk.bf16.gmra.mrb[64].mxu0 %vm2504_vm2, %v2417_v37 }
 0x582   : > { %2882 = vmatprep.mubr.bf16.mxu0 %v5376_v31 }
 0x589   : > { %4560 = vmatmul.mubr.msk.bf16.gmra.mrb[68].mxu0 %vm2504_vm2, %v2418_v28 }
 0x644   : > { %v2854_v52 = vpop.f32.mrb[56].mxu0 }
 0x645   : > { %v2921_v53 = vmul.f32 %v6263_v47, %v2854_v52  ;;  %v2856_v54 = vpop.f32.mrb[57].mxu0 }
 0x646   : > { %v2922_v55 = vmul.f32 %v6266_v49, %v2856_v54  ;;  %v2858_v58 = vpop.f32.mrb[58].mxu0 }
 0x647   : > { %v2950_v59 = vadd.f32 %v6269_v51, %v2921_v53  ;;  %v2923_v60 = vmul.f32 %v6263_v47, %v2858_v58  ;;  %v2860_v19 = vpop.f32.mrb[59].mxu0 }
 0x648   : > { %v2951_v61 = vadd.f32 %v6272_v63, %v2922_v55  ;;  %v2924_v43 = vmul.f32 %v6266_v49, %v2860_v19 }
 0x649   : > { %v2952_v46 = vadd.f32 %v6269_v51, %v2923_v60  ;;  %v2966_v50 = vmax.f32 %v2950_v59, 0.0 }
 0x64a   : > { %v2953_v48 = vadd.f32 %v6272_v63, %v2924_v43  ;;  %v2967_v5 = vmax.f32 %v2951_v61, 0.0 }
 0x64b   : > { %v2968_v4 = vmax.f32 %v2952_v46, 0.0 }
 0x64c   : > { %v2969_v6 = vmax.f32 %v2953_v48, 0.0  ;;  %v2864_v7 = vpop.f32.mrb[60].mxu0 }
 0x64d   : > { %v6282_v8 = vpack.c.bf16 %v2968_v4, %v2966_v50  ;;  %v2925_v9 = vmul.f32 %v6263_v47, %v2864_v7  ;;  %v2866_v10 = vpop.f32.mrb[61].mxu0 }
 0x64e   : > { %v2926_v12 = vmul.f32 %v6266_v49, %v2866_v10  ;;  %v2868_v14 = vpop.f32.mrb[62].mxu0  ;;  %v6286_v15 = vpack.c.bf16 %v2969_v6, %v2967_v5 }
 0x64f   : > { %v2954_v17 = vadd.f32 %v6269_v51, %v2925_v9  ;;  %v2927_v18 = vmul.f32 %v6263_v47, %v2868_v14  ;;  %v2870_v20 = vpop.f32.mrb[63].mxu0 }
 0x650   : > { %v2955_v21 = vadd.f32 %v6272_v63, %v2926_v12  ;;  %v2928_v22 = vmul.f32 %v6266_v49, %v2870_v20  ;;  %2990 = vmatprep.subr.bf16.mxu1 %v6286_v15  ;;  %v5274_v20 = vld [vmem:[%s6731_s7 + $0xe0] ss:$8 sps:$4 sm:$0xff]  }
 0x651   : > { %v2956_v23 = vadd.f32 %v6269_v51, %v2927_v18  ;;  %2991 = vmatpush1.bf16.msra.mxu1 %v6282_v8  ;;  %v2970_v35 = vmax.f32 %v2954_v17, 0.0  ;;  %v5276_v18 = vld [vmem:[%s6731_s7 + $0xe4] ss:$8 sps:$4 sm:$0xff]  }
 0x652   : > { %v2957_v34 = vadd.f32 %v6272_v63, %v2928_v22  ;;  %v2971_v38 = vmax.f32 %v2955_v21, 0.0  ;;  %v5277_v21 = vld [vmem:[%s6731_s7 + $0xf0] ss:$8 sps:$4 sm:$0xff]   ;;  %v5282_v22 = vld [vmem:[%s6731_s7 + $0x104] ss:$8 sps:$4 sm:$0xff]  }
 0x653   : > { %v2972_v36 = vmax.f32 %v2956_v23, 0.0  ;;  %v5280_v23 = vld [vmem:[%s6731_s7 + $0x100] ss:$8 sps:$4 sm:$0xff]  }
 0x654   : > { %v2973_v57 = vmax.f32 %v2957_v34, 0.0  ;;  %v2874_v62 = vpop.f32.mrb[64].mxu0  ;;  %v5288_v34 = vld [vmem:[%s6731_s7 + $0x124] ss:$8 sps:$4 sm:$0xff]  }
 0x655   : > { %v6296_v11 = vpack.c.bf16 %v2972_v36, %v2970_v35  ;;  %v2929_v16 = vmul.f32 %v6263_v47, %v2874_v62  ;;  %v2876_v30 = vpop.f32.mrb[65].mxu0  ;;  %v5286_v35 = vld [vmem:[%s6731_s7 + $0x120] ss:$8 sps:$4 sm:$0xff]   ;;  %v5294_v36 = vld [vmem:[%s6731_s7 + $0x4] ss:$8 sps:$4 sm:$0xff]  }
 0x656   : > { %v2930_v42 = vmul.f32 %v6266_v49, %v2876_v30  ;;  %v2878_v56 = vpop.f32.mrb[66].mxu0  ;;  %v6300_v13 = vpack.c.bf16 %v2973_v57, %v2971_v38  ;;  %v5292_v38 = vld [vmem:[%s6731_s7] ss:$8 sps:$4 sm:$0xff]   ;;  %v5297_v57 = vld [vmem:[%s6731_s7 + $0x14] ss:$8 sps:$4 sm:$0xff]  }
 0x657   : > { %v2958_v39 = vadd.f32 %v6269_v51, %v2929_v16  ;;  %v2931_v24 = vmul.f32 %v6263_v47, %v2878_v56  ;;  %v2880_v26 = vpop.f32.mrb[67].mxu0  ;;  %v5295_v62 = vld [vmem:[%s6731_s7 + $0x10] ss:$8 sps:$4 sm:$0xff]   ;;  %v5300_v16 = vld [vmem:[%s6731_s7 + $0x24] ss:$8 sps:$4 sm:$0xff]  }
 0x658   : > { %v2959_v28 = vadd.f32 %v6272_v63, %v2930_v42  ;;  %v2932_v44 = vmul.f32 %v6266_v49, %v2880_v26  ;;  %2992 = vmatprep.subr.bf16.mxu1 %v6300_v13  ;;  %v5298_v30 = vld [vmem:[%s6731_s7 + $0x20] ss:$8 sps:$4 sm:$0xff]   ;;  %v5301_v42 = vld [vmem:[%s6731_s7 + $0x30] ss:$8 sps:$4 sm:$0xff]   ;;  %v5306_v56 = vld [vmem:[%s6731_s7 + $0x44] ss:$8 sps:$4 sm:$0xff]  }
 0x659   : > { %v2960_v37 = vadd.f32 %v6269_v51, %v2931_v24  ;;  %2993 = vmatpush1.bf16.msra.mxu1 %v6296_v11  ;;  %v2974_v45 = vmax.f32 %v2958_v39, 0.0  ;;  %v5307_v39 = vld [vmem:[%s6731_s7 + $0x50] ss:$8 sps:$4 sm:$0xff]   ;;  %v5312_v24 = vld [vmem:[%s6731_s7 + $0x64] ss:$8 sps:$4 sm:$0xff]  }
 0x65a   : > { %v2961_v41 = vadd.f32 %v6272_v63, %v2932_v44  ;;  %v2975_v53 = vmax.f32 %v2959_v28, 0.0  ;;  %v5310_v26 = vld [vmem:[%s6731_s7 + $0x60] ss:$8 sps:$4 sm:$0xff]   ;;  %v5315_v28 = vld [vmem:[%s6731_s7 + $0x74] ss:$8 sps:$4 sm:$0xff]  }
 0x65b   : > { %v2976_v52 = vmax.f32 %v2960_v37, 0.0  ;;  %v5313_v44 = vld [vmem:[%s6731_s7 + $0x70] ss:$8 sps:$4 sm:$0xff]   ;;  %v5318_v37 = vld [vmem:[%s6731_s7 + $0x84] ss:$8 sps:$4 sm:$0xff]  }
 0x65c   : > { %v2977_v54 = vmax.f32 %v2961_v41, 0.0  ;;  %v2884_v55 = vpop.f32.mrb[68].mxu0  ;;  %v5316_v41 = vld [vmem:[%s6731_s7 + $0x80] ss:$8 sps:$4 sm:$0xff]  }
 0x65d   : > { %v6310_v58 = vpack.c.bf16 %v2976_v52, %v2974_v45  ;;  %v2933_v59 = vmul.f32 %v6263_v47, %v2884_v55  ;;  %v2886_v60 = vpop.f32.mrb[69].mxu0  ;;  %v5321_v45 = vld [vmem:[%s6731_s7 + $0x94] ss:$8 sps:$4 sm:$0xff]   ;;  %v5319_v52 = vld [vmem:[%s6731_s7 + $0x90] ss:$8 sps:$4 sm:$0xff]   ;;  %v5353_v55 = vld [vmem:[%s6735_s11] sm:$0xff]  }
 0x65e   : > { %v2934_v19 = vmul.f32 %v6266_v49, %v2886_v60  ;;  %v2888_v61 = vpop.f32.mrb[70].mxu0  ;;  %v6314_v43 = vpack.c.bf16 %v2977_v54, %v2975_v53  ;;  %v5324_v53 = vld [vmem:[%s6731_s7 + $0x144] ss:$8 sps:$4 sm:$0xff]   ;;  %v5356_v60 = vld [vmem:[%s6735_s11 + $0x50] sm:$0xff]  }
 0x65f   : > { %v2962_v46 = vadd.f32 %v6269_v51, %v2933_v59  ;;  %v2935_v48 = vmul.f32 %v6263_v47, %v2888_v61  ;;  %v2890_v50 = vpop.f32.mrb[71].mxu0  ;;  %v5352_v54 = vld [vmem:[%s6735_s11 + $0x40] sm:$0xff]   ;;  %v5355_v59 = vld [vmem:[%s6735_s11 + $0x8] sm:$0xff]   ;;  %v5358_v61 = vld [vmem:[%s6735_s11 + $0x58] sm:$0xff]  }
 0x660   : > { %v2963_v4 = vadd.f32 %v6272_v63, %v2934_v19  ;;  %v2936_v5 = vmul.f32 %v6266_v49, %v2890_v50  ;;  %2994 = vmatprep.subr.bf16.mxu1 %v6314_v43  ;;  %v5267_v49 = vld [vmem:[%s6731_s7 + $0xb4] ss:$8 sps:$4 sm:$0xff]   ;;  %4752 = vmatprep.subr.bf16.mxu0 %v5352_v54 }
 0x661   : > { %v2964_v6 = vadd.f32 %v6269_v51, %v2935_v48  ;;  %2995 = vmatpush1.bf16.msra.mxu1 %v6310_v58  ;;  %v2978_v9 = vmax.f32 %v2962_v46, 0.0  ;;  %v5268_v51 = vld [vmem:[%s6731_s7 + $0xc0] ss:$8 sps:$4 sm:$0xff]   ;;  %4753 = vmatpush3.bf16.msra.mxu0 %v5353_v55  ;;  %v5357_v19 = vld [vmem:[%s6735_s11 + $0x10] sm:$0xff]  }
 0x662   : > { %v2965_v7 = vadd.f32 %v6272_v63, %v2936_v5  ;;  %v2979_v12 = vmax.f32 %v2963_v4, 0.0  ;;  %v5271_v63 = vld [vmem:[%s6731_s7 + $0xd0] ss:$8 sps:$4 sm:$0xff]   ;;  %v5360_v46 = vld [vmem:[%s6735_s11 + $0x60] sm:$0xff]  }
 0x663   : > { %v2980_v10 = vmax.f32 %v2964_v6, 0.0  ;;  %v5361_v48 = vld [vmem:[%s6735_s11 + $0x20] sm:$0xff]  }
 0x664   : > { %v2981_v14 = vmax.f32 %v2965_v7, 0.0 }
 0x665   : > { %v6324_v17 = vpack.c.bf16 %v2980_v10, %v2978_v9  ;;  %v5322_v10 = vld [vmem:[%s6731_s7 + $0x140] ss:$8 sps:$4 sm:$0xff]  }
 0x666   : > { %v6326_v47 = vpack.c.bf16 %v2981_v14, %v2979_v12  ;;  %v5327_v12 = vld [vmem:[%s6731_s7 + $0x154] ss:$8 sps:$4 sm:$0xff]   ;;  %v5325_v14 = vld [vmem:[%s6731_s7 + $0x150] ss:$8 sps:$4 sm:$0xff]  }
 0x668   : > { %2996 = vmatprep.subr.bf16.mxu1 %v6326_v47 }
 0x669   : > { %2997 = vmatpush1.bf16.msra.mxu1 %v6324_v17 }
 0x66a   : > { %3071 = vmatprep.subr.bf16.mxu1 %v6286_v15 }
 0x66c   : > { %4562 = vmatmul.mubr.msk.bf16.vlgmr.msra.gmra.mrb[88].mxu1 %vm1948_vm1, %v6100_v33  ;;  %v5264_v33 = vld [vmem:[%s6731_s7 + $0xa4] ss:$8 sps:$4 sm:$0xff]  }
 0x66d   : > { %3072 = vmatpush1.bf16.msra.mxu1 %v6282_v8  ;;  %3032 = vmatprep.mubr.bf16.mxu1 %v5376_v31 }
 0x66e   : > { %3073 = vmatprep.subr.bf16.mxu1 %v6300_v13 }
 0x671   : > { %3074 = vmatpush1.bf16.msra.mxu1 %v6296_v11 }
 0x672   : > { %3075 = vmatprep.subr.bf16.mxu1 %v6314_v43 }
 0x674   : > { %4563 = vmatmul.mubr.msk.bf16.gmra.mrb[92].mxu1 %vm1948_vm1, %v6149_v0  ;;  %v5262_v0 = vld [vmem:[%s6731_s7 + $0xa0] ss:$8 sps:$4 sm:$0xff]  }
 0x675   : > { %3076 = vmatpush1.bf16.msra.mxu1 %v6310_v58  ;;  %3042 = vmatprep.mubr.bf16.mxu1 %v5376_v31 }
 0x676   : > { %3077 = vmatprep.subr.bf16.mxu1 %v6326_v47 }
 0x679   : > { %3078 = vmatpush1.bf16.msra.mxu1 %v6324_v17 }
 0x67a   : > { %3306 = vmatprep.subr.bf16.mxu1 %v5264_v33  ;;  %v5330_v33 = vld [vmem:[%s6731_s7 + $0x164] ss:$8 sps:$4 sm:$0xff]  }
 0x67c   : > { %4564 = vmatmul.mubr.msk.bf16.gmra.mrb[96].mxu1 %vm1948_vm1, %v6154_v1  ;;  %v5265_v1 = vld [vmem:[%s6731_s7 + $0xb0] ss:$8 sps:$4 sm:$0xff]  }
 0x67d   : > { %3052 = vmatprep.mubr.bf16.mxu1 %v5376_v31 }
 0x684   : > { %4565 = vmatmul.mubr.msk.bf16.gmra.mrb[100].mxu1 %vm1948_vm1, %v6166_v2  ;;  %v5270_v2 = vld [vmem:[%s6731_s7 + $0xc4] ss:$8 sps:$4 sm:$0xff]  }
 0x685   : > { %3103 = vmatprep.mubr.bf16.mxu1 %v5376_v31 }
 0x68c   : > { %4566 = vmatmul.mubr.msk.bf16.vlgmr.msra.gmra.mrb[104].mxu1 %vm1948_vm1, %v6171_v3  ;;  %v5273_v3 = vld [vmem:[%s6731_s7 + $0xd4] ss:$8 sps:$4 sm:$0xff]  }
 0x68d   : > { %3307 = vmatpush1.bf16.msra.mxu1 %v5262_v0  ;;  %3113 = vmatprep.mubr.bf16.mxu1 %v5376_v31 }
 0x68e   : > { %3308 = vmatprep.subr.bf16.mxu1 %v5267_v49 }
 0x691   : > { %3309 = vmatpush1.bf16.msra.mxu1 %v5265_v1 }
 0x692   : > { %3310 = vmatprep.subr.bf16.mxu1 %v5270_v2 }
 0x694   : > { %4567 = vmatmul.mubr.msk.bf16.gmra.mrb[108].mxu1 %vm1948_vm1, %v6180_v25  ;;  %v5279_v25 = vld [vmem:[%s6731_s7 + $0xf4] ss:$8 sps:$4 sm:$0xff]  }
 0x695   : > { %3311 = vmatpush1.bf16.msra.mxu1 %v5268_v51  ;;  %3123 = vmatprep.mubr.bf16.mxu1 %v5376_v31  ;;  %v5328_v51 = vld [vmem:[%s6731_s7 + $0x160] ss:$8 sps:$4 sm:$0xff]  }
 0x696   : > { %3312 = vmatprep.subr.bf16.mxu1 %v5273_v3  ;;  %v5333_v3 = vld [vmem:[%s6731_s7 + $0x174] ss:$8 sps:$4 sm:$0xff]  }
 0x699   : > { %3313 = vmatpush1.bf16.msra.mxu1 %v5271_v63  ;;  %v5331_v63 = vld [vmem:[%s6731_s7 + $0x170] ss:$8 sps:$4 sm:$0xff]  }
 0x69a   : > { %3314 = vmatprep.subr.bf16.mxu1 %v5276_v18 }
 0x69c   : > { %4568 = vmatmul.mubr.msk.bf16.gmra.mrb[112].mxu1 %vm1948_vm1, %v6185_v27  ;;  %v5285_v27 = vld [vmem:[%s6731_s7 + $0x114] ss:$8 sps:$4 sm:$0xff]  }
 0x69d   : > { %3315 = vmatpush1.bf16.msra.mxu1 %v5274_v20  ;;  %3133 = vmatprep.mubr.bf16.mxu1 %v5376_v31  ;;  %v5283_v31 = vld [vmem:[%s6731_s7 + $0x110] ss:$8 sps:$4 sm:$0xff]  }
 0x69e   : > { %3316 = vmatprep.subr.bf16.mxu1 %v5279_v25  ;;  %v5336_v25 = vld [vmem:[%s6731_s7 + $0x184] ss:$8 sps:$4 sm:$0xff]  }
 0x6a1   : > { %3317 = vmatpush1.bf16.msra.mxu1 %v5277_v21 }
 0x6a2   : > { %3318 = vmatprep.subr.bf16.mxu1 %v5282_v22 }
 0x6a4   : > { %4569 = vmatmul.mubr.msk.bf16.gmra.mrb[116].mxu1 %vm1948_vm1, %v6194_v40  ;;  %v5291_v40 = vld [vmem:[%s6731_s7 + $0x134] ss:$8 sps:$4 sm:$0xff]  }
 0x6a5   : > { %3319 = vmatpush1.bf16.msra.mxu1 %v5280_v23  ;;  %4610 = vmatprep.mubr.msk.bf16.mxu1 %vm3293_vm3, %v6286_v15  ;;  %v5289_v15 = vld [vmem:[%s6731_s7 + $0x130] ss:$8 sps:$4 sm:$0xff]  }
 0x6a6   : > { %3320 = vmatprep.subr.bf16.mxu1 %v5285_v27 }
 0x6a9   : > { %3321 = vmatpush1.bf16.msra.mxu1 %v5283_v31  ;;  %v5334_v31 = vld [vmem:[%s6731_s7 + $0x180] ss:$8 sps:$4 sm:$0xff]  }
 0x6aa   : > { %3322 = vmatprep.subr.bf16.mxu1 %v5288_v34  ;;  %v5339_v34 = vld [vmem:[%s6731_s7 + $0x194] ss:$8 sps:$4 sm:$0xff]  }
 0x6ad   : > { %3323 = vmatpush1.bf16.msra.mxu1 %v5286_v35  ;;  %v5337_v35 = vld [vmem:[%s6731_s7 + $0x190] ss:$8 sps:$4 sm:$0xff]  }
 0x6ae   : > { %3324 = vmatprep.subr.bf16.mxu1 %v5291_v40 }
 0x6b1   : > { %3325 = vmatpush1.bf16.msra.mxu1 %v5289_v15 }
 0x6b2   : > { %3491 = vmatprep.subr.bf16.mxu1 %v5294_v36  ;;  %v5342_v36 = vld [vmem:[%s6731_s7 + $0x1a4] ss:$8 sps:$4 sm:$0xff]  }
 0x6b4   : > { %3339 = vmatmul.mubr.bf16.vlgmr.msra.gmra.mrb[120].mxu1 %v6282_v8  ;;  %v5303_v8 = vld [vmem:[%s6731_s7 + $0x34] ss:$8 sps:$4 sm:$0xff]  }
 0x6b5   : > { %4611 = vmatprep.mubr.msk.bf16.mxu1 %vm3293_vm3, %v6300_v13  ;;  %3492 = vmatpush1.bf16.msra.mxu1 %v5292_v38  ;;  %v5304_v13 = vld [vmem:[%s6731_s7 + $0x40] ss:$8 sps:$4 sm:$0xff]  }
 0x6b6   : > { %3493 = vmatprep.subr.bf16.mxu1 %v5297_v57 }
 0x6b9   : > { %3494 = vmatpush1.bf16.msra.mxu1 %v5295_v62 }
 0x6ba   : > { %3495 = vmatprep.subr.bf16.mxu1 %v5300_v16 }
 0x6bc   : > { %3349 = vmatmul.mubr.bf16.gmra.mrb[124].mxu1 %v6296_v11  ;;  %v5309_v11 = vld [vmem:[%s6731_s7 + $0x54] ss:$8 sps:$4 sm:$0xff]  }
 0x6bd   : > { %4612 = vmatprep.mubr.msk.bf16.mxu1 %vm3293_vm3, %v6314_v43  ;;  %3496 = vmatpush1.bf16.msra.mxu1 %v5298_v30  ;;  %v5359_v43 = vld [vmem:[%s6735_s11 + $0x18] sm:$0xff]   ;;  %v5340_v30 = vld [vmem:[%s6731_s7 + $0x1a0] ss:$8 sps:$4 sm:$0xff]  }
 0x6be   : > { %3497 = vmatprep.subr.bf16.mxu1 %v5303_v8  ;;  %v5345_v8 = vld [vmem:[%s6731_s7 + $0x1b4] ss:$8 sps:$4 sm:$0xff]  }
 0x6c1   : > { %3498 = vmatpush1.bf16.msra.mxu1 %v5301_v42  ;;  %v5343_v42 = vld [vmem:[%s6731_s7 + $0x1b0] ss:$8 sps:$4 sm:$0xff]  }
 0x6c2   : > { %3499 = vmatprep.subr.bf16.mxu1 %v5306_v56 }
 0x6c4   : > { %3359 = vmatmul.mubr.bf16.gmra.mrb[128].mxu1 %v6310_v58  ;;  %v5354_v58 = vld [vmem:[%s6735_s11 + $0x48] sm:$0xff]  }
 0x6c5   : > { %4613 = vmatprep.mubr.msk.bf16.mxu1 %vm3293_vm3, %v6326_v47  ;;  %3500 = vmatpush1.bf16.msra.mxu1 %v5304_v13 }
 0x6c6   : > { %3501 = vmatprep.subr.bf16.mxu1 %v5309_v11  ;;  %4754 = vmatprep.subr.bf16.mxu0 %v5354_v58  ;;  %v5348_v11 = vld [vmem:[%s6731_s7 + $0x1c4] ss:$8 sps:$4 sm:$0xff]  }
 0x6c7   : > { %4755 = vmatpush3.bf16.msra.mxu0 %v5355_v59 }
 0x6c8   : > { %4756 = vmatprep.subr.bf16.mxu0 %v5356_v60 }
 0x6c9   : > { %3502 = vmatpush1.bf16.msra.mxu1 %v5307_v39 }
 0x6ca   : > { %3503 = vmatprep.subr.bf16.mxu1 %v5312_v24 }
 0x6cb   : > { %4757 = vmatpush3.bf16.msra.mxu0 %v5357_v19 }
 0x6cc   : > { %3369 = vmatmul.mubr.bf16.gmra.mrb[132].mxu1 %v6324_v17  ;;  %4758 = vmatprep.subr.bf16.mxu0 %v5358_v61 }
 0x6cd   : > { %3504 = vmatpush1.bf16.msra.mxu1 %v5310_v26 }
 0x6ce   : > { %3505 = vmatprep.subr.bf16.mxu1 %v5315_v28  ;;  %v5346_v28 = vld [vmem:[%s6731_s7 + $0x1c0] ss:$8 sps:$4 sm:$0xff]  }
 0x6cf   : > { %4759 = vmatpush3.bf16.msra.mxu0 %v5359_v43 }
 0x6d0   : > { %4760 = vmatprep.subr.bf16.mxu0 %v5360_v46 }
 0x6d1   : > { %3506 = vmatpush1.bf16.msra.mxu1 %v5313_v44 }
 0x6d2   : > { %3507 = vmatprep.subr.bf16.mxu1 %v5318_v37  ;;  %v5351_v37 = vld [vmem:[%s6731_s7 + $0x1d4] ss:$8 sps:$4 sm:$0xff]  }
 0x6d3   : > { %4761 = vmatpush3.bf16.msra.mxu0 %v5361_v48 }
 0x6d5   : > { %3508 = vmatpush1.bf16.msra.mxu1 %v5316_v41  ;;  %v5349_v41 = vld [vmem:[%s6731_s7 + $0x1d0] ss:$8 sps:$4 sm:$0xff]  }
 0x6d6   : > { %3509 = vmatprep.subr.bf16.mxu1 %v5321_v45 }
 0x6d9   : > { %3510 = vmatpush1.bf16.msra.mxu1 %v5319_v52 }
 0x6da   : > { %3697 = vmatprep.subr.bf16.mxu1 %v5324_v53 }
 0x73f   : > { %v3024_v50 = vpop.f32.mrb[88].mxu1 }
 0x740   : > { %v3026_v4 = vpop.f32.mrb[89].mxu1 }
 0x741   : > { %v3028_v5 = vpop.f32.mrb[90].mxu1 }
 0x742   : > { %v3063_v6 = vpack.c.bf16 %v3028_v5, %v3024_v50  ;;  %v3030_v7 = vpop.f32.mrb[91].mxu1 }
 0x743   : > { %v3064_v9 = vpack.c.bf16 %v3030_v7, %v3026_v4 }
 0x745   : > { %4634 = vmatprep.mubr.msk.bf16.mxu1 %vm3293_vm3, %v3064_v9  ;;  %v5362_v9 = vld [vmem:[%s6735_s11 + $0x68] sm:$0xff]  }
 0x746   : > { %3524 = vmatmul.mubr.bf16.vlgmr.msra.gmra.mrb[120].mxu1 %v3063_v6  ;;  %4762 = vmatprep.subr.bf16.mxu0 %v5362_v9 }
 0x747   : > { %3698 = vmatpush1.bf16.msra.mxu1 %v5322_v10  ;;  %v3034_v17 = vpop.f32.mrb[92].mxu1  ;;  %v5363_v10 = vld [vmem:[%s6735_s11 + $0x28] sm:$0xff]  }
 0x748   : > { %3699 = vmatprep.subr.bf16.mxu1 %v5327_v12  ;;  %v3036_v47 = vpop.f32.mrb[93].mxu1  ;;  %4763 = vmatpush3.bf16.msra.mxu0 %v5363_v10  ;;  %v5364_v12 = vld [vmem:[%s6735_s11 + $0x70] sm:$0xff]  }
 0x749   : > { %v3038_v0 = vpop.f32.mrb[94].mxu1  ;;  %4764 = vmatprep.subr.bf16.mxu0 %v5364_v12 }
 0x74a   : > { %v3065_v49 = vpack.c.bf16 %v3038_v0, %v3034_v17  ;;  %v3040_v1 = vpop.f32.mrb[95].mxu1  ;;  %v5366_v17 = vld [vmem:[%s6735_s11 + $0x78] sm:$0xff]   ;;  %v4682_v0 = vld [vmem:[%s6732_s8 + $0x1] ss:$2 sm:$0x3] }
 0x74b   : > { %3700 = vmatpush1.bf16.msra.mxu1 %v5325_v14  ;;  %v3066_v2 = vpack.c.bf16 %v3040_v1, %v3036_v47  ;;  %v5365_v14 = vld [vmem:[%s6735_s11 + $0x30] sm:$0xff]   ;;  %v5367_v47 = vld [vmem:[%s6735_s11 + $0x38] sm:$0xff]  }
 0x74c   : > { %3701 = vmatprep.subr.bf16.mxu1 %v5330_v33  ;;  %4765 = vmatpush3.bf16.msra.mxu0 %v5365_v14  ;;  %v3786_v33 = vld [vmem:[%s6732_s8] ss:$2 sm:$0x3] }
 0x74d   : > { %4635 = vmatprep.mubr.msk.bf16.mxu1 %vm3293_vm3, %v3066_v2  ;;  %4766 = vmatprep.subr.bf16.mxu0 %v5366_v17  ;;  %v6619_v1 = vrot.slane %v3786_v33, %v5717_v32  ;;  %v6622_v2 = vrot.slane %v4682_v0, %v5712_v29 }
 0x74e   : > { %3534 = vmatmul.mubr.bf16.gmra.mrb[124].mxu1 %v3065_v49  ;;  %v6616_v49 = vrot.slane %v3786_v33, %v5712_v29 }
 0x74f   : > { %3702 = vmatpush1.bf16.msra.mxu1 %v5328_v51  ;;  %v3044_v18 = vpop.f32.mrb[96].mxu1 }
 0x750   : > { %3703 = vmatprep.subr.bf16.mxu1 %v5333_v3  ;;  %v3046_v20 = vpop.f32.mrb[97].mxu1  ;;  %4767 = vmatpush3.bf16.msra.mxu0 %v5367_v47  ;;  %v6625_v3 = vrot.slane %v4682_v0, %v5717_v32 }
 0x751   : > { %v3048_v21 = vpop.f32.mrb[98].mxu1 }
 0x752   : > { %v3067_v22 = vpack.c.bf16 %v3048_v21, %v3044_v18  ;;  %v3050_v23 = vpop.f32.mrb[99].mxu1 }
 0x753   : > { %3704 = vmatpush1.bf16.msra.mxu1 %v5331_v63  ;;  %v3068_v27 = vpack.c.bf16 %v3050_v23, %v3046_v20 }
 0x754   : > { %3705 = vmatprep.subr.bf16.mxu1 %v5336_v25 }
 0x755   : > { %4636 = vmatprep.mubr.msk.bf16.mxu1 %vm3293_vm3, %v3068_v27 }
 0x756   : > { %3544 = vmatmul.mubr.bf16.gmra.mrb[128].mxu1 %v3067_v22 }
 0x757   : > { %3706 = vmatpush1.bf16.msra.mxu1 %v5334_v31  ;;  %v3054_v40 = vpop.f32.mrb[100].mxu1 }
 0x758   : > { %3707 = vmatprep.subr.bf16.mxu1 %v5339_v34  ;;  %v3056_v15 = vpop.f32.mrb[101].mxu1 }
 0x759   : > { %v3058_v38 = vpop.f32.mrb[102].mxu1 }
 0x75a   : > { %v3069_v57 = vpack.c.bf16 %v3058_v38, %v3054_v40  ;;  %v3060_v62 = vpop.f32.mrb[103].mxu1 }
 0x75b   : > { %3708 = vmatpush1.bf16.msra.mxu1 %v5337_v35  ;;  %v3070_v16 = vpack.c.bf16 %v3060_v62, %v3056_v15 }
 0x75c   : > { %3709 = vmatprep.subr.bf16.mxu1 %v5342_v36 }
 0x75d   : > { %4637 = vmatprep.mubr.msk.bf16.mxu1 %vm3293_vm3, %v3070_v16 }
 0x75e   : > { %3554 = vmatmul.mubr.bf16.gmra.mrb[132].mxu1 %v3069_v57 }
 0x75f   : > { %3710 = vmatpush1.bf16.msra.mxu1 %v5340_v30  ;;  %v3105_v56 = vpop.f32.mrb[104].mxu1 }
 0x760   : > { %3711 = vmatprep.subr.bf16.mxu1 %v5345_v8  ;;  %v3107_v13 = vpop.f32.mrb[105].mxu1 }
 0x761   : > { %v3109_v39 = vpop.f32.mrb[106].mxu1 }
 0x762   : > { %v3144_v24 = vpack.c.bf16 %v3109_v39, %v3105_v56  ;;  %v3111_v26 = vpop.f32.mrb[107].mxu1 }
 0x763   : > { %3712 = vmatpush1.bf16.msra.mxu1 %v5343_v42  ;;  %v3145_v44 = vpack.c.bf16 %v3111_v26, %v3107_v13 }
 0x764   : > { %3713 = vmatprep.subr.bf16.mxu1 %v5348_v11 }
 0x765   : > { %4678 = vmatprep.mubr.msk.bf16.mxu1 %vm3293_vm3, %v3145_v44 }
 0x767   : > { %3714 = vmatpush1.bf16.msra.mxu1 %v5346_v28  ;;  %v3115_v45 = vpop.f32.mrb[108].mxu1 }
 0x768   : > { %3715 = vmatprep.subr.bf16.mxu1 %v5351_v37  ;;  %v3117_v52 = vpop.f32.mrb[109].mxu1 }
 0x769   : > { %v3119_v53 = vpop.f32.mrb[110].mxu1 }
 0x76a   : > { %v3146_v54 = vpack.c.bf16 %v3119_v53, %v3115_v45  ;;  %v3121_v55 = vpop.f32.mrb[111].mxu1 }
 0x76b   : > { %3716 = vmatpush1.bf16.msra.mxu1 %v5349_v41  ;;  %v3147_v58 = vpack.c.bf16 %v3121_v55, %v3117_v52 }
 0x76e   : > { %3730 = vmatmul.mubr.bf16.vlgmr.msra.gmra.mrb[120].mxu1 %v3144_v24 }
 0x76f   : > { %4679 = vmatprep.mubr.msk.bf16.mxu1 %vm3293_vm3, %v3147_v58  ;;  %v3125_v59 = vpop.f32.mrb[112].mxu1 }
 0x770   : > { %v3127_v60 = vpop.f32.mrb[113].mxu1 }
 0x771   : > { %v3129_v19 = vpop.f32.mrb[114].mxu1 }
 0x772   : > { %v3148_v61 = vpack.c.bf16 %v3129_v19, %v3125_v59  ;;  %v3131_v43 = vpop.f32.mrb[115].mxu1 }
 0x773   : > { %v3149_v46 = vpack.c.bf16 %v3131_v43, %v3127_v60 }
 0x776   : > { %3740 = vmatmul.mubr.bf16.gmra.mrb[124].mxu1 %v3146_v54 }
 0x777   : > { %4680 = vmatprep.mubr.msk.bf16.mxu1 %vm3293_vm3, %v3149_v46  ;;  %v3135_v48 = vpop.f32.mrb[116].mxu1 }
 0x778   : > { %v3137_v50 = vpop.f32.mrb[117].mxu1 }
 0x779   : > { %v3139_v4 = vpop.f32.mrb[118].mxu1 }
 0x77a   : > { %v3150_v5 = vpack.c.bf16 %v3139_v4, %v3135_v48  ;;  %v3141_v6 = vpop.f32.mrb[119].mxu1 }
 0x77b   : > { %v3151_v7 = vpack.c.bf16 %v3141_v6, %v3137_v50 }
 0x77e   : > { %3750 = vmatmul.mubr.bf16.gmra.mrb[128].mxu1 %v3148_v61 }
 0x77f   : > { %4681 = vmatprep.mubr.msk.bf16.mxu1 %vm3293_vm3, %v3151_v7 }
 0x786   : > { %3760 = vmatmul.mubr.bf16.gmra.mrb[132].mxu1 %v3150_v5 }
 0x841   : > { %v3731_v51 = vpop.f32.mrb[120].mxu1 }
 0x842   : > { %v3798_v63 = vmul.f32 %v6616_v49, %v3731_v51  ;;  %v3733_v18 = vpop.f32.mrb[121].mxu1 }
 0x843   : > { %v3799_v20 = vmul.f32 %v6619_v1, %v3733_v18  ;;  %v3735_v25 = vpop.f32.mrb[122].mxu1 }
 0x844   : > { %v3827_v21 = vadd.f32 %v6622_v2, %v3798_v63  ;;  %v3800_v22 = vmul.f32 %v6616_v49, %v3735_v25  ;;  %v3737_v23 = vpop.f32.mrb[123].mxu1 }
 0x845   : > { %v3828_v27 = vadd.f32 %v6625_v3, %v3799_v20  ;;  %v3801_v29 = vmul.f32 %v6619_v1, %v3737_v23 }
 0x846   : > { %v3829_v31 = vadd.f32 %v6622_v2, %v3800_v22  ;;  %v3843_v34 = vmax.f32 %v3827_v21, 0.0 }
 0x847   : > { %v3830_v32 = vadd.f32 %v6625_v3, %v3801_v29  ;;  %v3844_v40 = vmax.f32 %v3828_v27, 0.0 }
 0x848   : > { %v3845_v35 = vmax.f32 %v3829_v31, 0.0 }
 0x849   : > { %v3846_v15 = vmax.f32 %v3830_v32, 0.0  ;;  %v3741_v36 = vpop.f32.mrb[124].mxu1 }
 0x84a   : > { %v3859_v38 = vpack.c.bf16 %v3845_v35, %v3843_v34  ;;  %v3802_v57 = vmul.f32 %v6616_v49, %v3741_v36  ;;  %v3743_v62 = vpop.f32.mrb[125].mxu1  ;;  %v5379_v34 = vmov 0.0   ;;  %v4061_v36 = vld [vmem:[%s6736_s12 + $0x8] sm:$0xff] }
 0x84b   : > { %v3803_v16 = vmul.f32 %v6619_v1, %v3743_v62  ;;  %v3745_v30 = vpop.f32.mrb[126].mxu1  ;;  %v3860_v8 = vpack.c.bf16 %v3846_v15, %v3844_v40  ;;  %v4060_v40 = vld [vmem:[%s6736_s12] sm:$0xff] }
 0x84c   : > { %v3831_v42 = vadd.f32 %v6622_v2, %v3802_v57  ;;  %v3804_v56 = vmul.f32 %v6616_v49, %v3745_v30  ;;  %v3747_v13 = vpop.f32.mrb[127].mxu1 }
 0x84d   : > { %v3832_v11 = vadd.f32 %v6625_v3, %v3803_v16  ;;  %v3805_v39 = vmul.f32 %v6619_v1, %v3747_v13  ;;  %4027 = vmatprep.mubr.bf16.mxu0 %v3860_v8  ;;  %v4062_v13 = vld [vmem:[%s6736_s12 + $0x10] sm:$0xff] }
 0x84e   : > { %v3833_v24 = vadd.f32 %v6622_v2, %v3804_v56  ;;  %4028 = vmatmul.mubr.bf16.vlgmr.msra.gmra.mrb[72].mxu0 %v3859_v38  ;;  %v3847_v28 = vmax.f32 %v3831_v42, 0.0 }
 0x84f   : > { %v3834_v26 = vadd.f32 %v6625_v3, %v3805_v39  ;;  %v3848_v37 = vmax.f32 %v3832_v11, 0.0  ;;  %v4063_v39 = vld [vmem:[%s6736_s12 + $0x18] sm:$0xff] }
 0x850   : > { %v3849_v44 = vmax.f32 %v3833_v24, 0.0 }
 0x851   : > { %v3850_v41 = vmax.f32 %v3834_v26, 0.0  ;;  %v3751_v45 = vpop.f32.mrb[128].mxu1 }
 0x852   : > { %v3806_v52 = vmul.f32 %v6616_v49, %v3751_v45  ;;  %v3753_v53 = vpop.f32.mrb[129].mxu1  ;;  %v3861_v54 = vpack.c.bf16 %v3849_v44, %v3847_v28 }
 0x853   : > { %v3807_v55 = vmul.f32 %v6619_v1, %v3753_v53  ;;  %v3755_v58 = vpop.f32.mrb[130].mxu1  ;;  %v3862_v59 = vpack.c.bf16 %v3850_v41, %v3848_v37  ;;  %v4064_v53 = vld [vmem:[%s6736_s12 + $0x20] sm:$0xff] }
 0x854   : > { %v3835_v60 = vadd.f32 %v6622_v2, %v3806_v52  ;;  %v3808_v19 = vmul.f32 %v6616_v49, %v3755_v58  ;;  %v3757_v61 = vpop.f32.mrb[131].mxu1 }
 0x855   : > { %v3836_v43 = vadd.f32 %v6625_v3, %v3807_v55  ;;  %v3809_v46 = vmul.f32 %v6619_v1, %v3757_v61  ;;  %4035 = vmatprep.mubr.bf16.mxu0 %v3862_v59  ;;  %v4065_v55 = vld [vmem:[%s6736_s12 + $0x28] sm:$0xff] }
 0x856   : > { %v3837_v48 = vadd.f32 %v6622_v2, %v3808_v19  ;;  %4036 = vmatmul.mubr.bf16.gmra.mrb[76].mxu0 %v3861_v54  ;;  %v3851_v4 = vmax.f32 %v3835_v60, 0.0 }
 0x857   : > { %v3838_v50 = vadd.f32 %v6625_v3, %v3809_v46  ;;  %v3852_v6 = vmax.f32 %v3836_v43, 0.0 }
 0x858   : > { %v3853_v5 = vmax.f32 %v3837_v48, 0.0 }
 0x859   : > { %v3854_v7 = vmax.f32 %v3838_v50, 0.0  ;;  %v3761_v9 = vpop.f32.mrb[132].mxu1  ;;  %v4066_v50 = vld [vmem:[%s6736_s12 + $0x30] sm:$0xff] }
 0x85a   : > { %v3810_v10 = vmul.f32 %v6616_v49, %v3761_v9  ;;  %v3763_v12 = vpop.f32.mrb[133].mxu1  ;;  %v3863_v14 = vpack.c.bf16 %v3853_v5, %v3851_v4  ;;  %v4067_v5 = vld [vmem:[%s6736_s12 + $0x38] sm:$0xff] }
 0x85b   : > { %v3811_v17 = vmul.f32 %v6619_v1, %v3763_v12  ;;  %v3765_v47 = vpop.f32.mrb[134].mxu1  ;;  %v3864_v33 = vpack.c.bf16 %v3854_v7, %v3852_v6  ;;  %v4151_v12 = vld [vmem:[%s6738_s14 + $0x8] sm:$0xff] }
 0x85c   : > { %v3839_v0 = vadd.f32 %v6622_v2, %v3810_v10  ;;  %v3812_v51 = vmul.f32 %v6616_v49, %v3765_v47  ;;  %v3767_v63 = vpop.f32.mrb[135].mxu1  ;;  %v5377_v49 = vmov 0.0|0.0   ;;  %v4150_v10 = vld [vmem:[%s6738_s14] sm:$0xff] }
 0x85d   : > { %v3840_v18 = vadd.f32 %v6625_v3, %v3811_v17  ;;  %v3813_v20 = vmul.f32 %v6619_v1, %v3767_v63  ;;  %4043 = vmatprep.mubr.bf16.mxu0 %v3864_v33  ;;  %4935 = vmatprep.subr.bf16.mxu0 %v5377_v49  ;;  %v4076_v17 = vld [vmem:[%s6737_s13] sm:$0xff]  ;;  %v4948_v47 = vpack.c.bf16 %v4151_v12, %v4150_v10  ;;  %v4152_v33 = vld [vmem:[%s6738_s14 + $0x10] sm:$0xff] }
 0x85e   : > { %v3841_v25 = vadd.f32 %v6622_v2, %v3812_v51  ;;  %4044 = vmatmul.mubr.bf16.gmra.mrb[80].mxu0 %v3863_v14  ;;  %v3855_v22 = vmax.f32 %v3839_v0, 0.0  ;;  %v4153_v0 = vld [vmem:[%s6738_s14 + $0x18] sm:$0xff]  ;;  %v4154_v63 = vld [vmem:[%s6738_s14 + $0x20] sm:$0xff] }
 0x85f   : > { %v3842_v21 = vadd.f32 %v6625_v3, %v3813_v20  ;;  %v3856_v27 = vmax.f32 %v3840_v18, 0.0  ;;  %v4951_v51 = vpack.c.bf16 %v4153_v0, %v4152_v33 }
 0x860   : > { %v3857_v23 = vmax.f32 %v3841_v25, 0.0  ;;  %v4700_v25 = vld [vmem:[%s6739_s15] ss:$0 sm:$0xff] }
 0x861   : > { %v3858_v29 = vmax.f32 %v3842_v21, 0.0 }
 0x862   : > { %v3865_v31 = vpack.c.bf16 %v3857_v23, %v3855_v22 }
 0x863   : > { %v3866_v32 = vpack.c.bf16 %v3858_v29, %v3856_v27 }
 0x865   : > { %4051 = vmatprep.mubr.bf16.mxu0 %v3866_v32 }
 0x866   : > { %4052 = vmatmul.mubr.bf16.gmra.mrb[84].mxu0 %v3865_v31 }
 0x867   : > { %4919 = vmatprep.mubr.msk.f32.mxu0 %vm5378_vm4, %v5379_v34 }
 0x921   : > { %v4768_v1 = vpop.f32.mrb[72].mxu0 }
 0x922   : > { %v4769_v2 = vpop.f32.mrb[73].mxu0 }
 0x923   : > { %v4770_v35 = vadd.f32 %v4769_v2, %v4768_v1  ;;  %v4771_v3 = vpop.f32.mrb[74].mxu0 }
 0x924   : > { %v4772_v15 = vpop.f32.mrb[75].mxu0 }
 0x925   : > { %v4773_v38 = vadd.f32 %v4772_v15, %v4771_v3  ;;  %v4068_v57 = vmul.f32 %v4770_v35, %v4060_v40 }
 0x927   : > { %v4069_v62 = vmul.f32 %v4773_v38, %v4061_v36 }
 0x929   : > { %v4936_v16 = vpack.c.bf16 %v4069_v62, %v4068_v57  ;;  %v4774_v30 = vpop.f32.mrb[76].mxu0 }
 0x92a   : > { %v4775_v8 = vpop.f32.mrb[77].mxu0 }
 0x92b   : > { %v4776_v42 = vadd.f32 %v4775_v8, %v4774_v30  ;;  %v4777_v56 = vpop.f32.mrb[78].mxu0  ;;  %4937 = vmatpush3.bf16.msra.mxu0 %v4936_v16 }
 0x92c   : > { %v4778_v11 = vpop.f32.mrb[79].mxu0  ;;  %4938 = vmatprep.subr.bf16.mxu0 %v5377_v49 }
 0x92d   : > { %v4779_v24 = vadd.f32 %v4778_v11, %v4777_v56  ;;  %v4070_v26 = vmul.f32 %v4776_v42, %v4062_v13 }
 0x92f   : > { %v4071_v28 = vmul.f32 %v4779_v24, %v4063_v39 }
 0x931   : > { %v4939_v44 = vpack.c.bf16 %v4071_v28, %v4070_v26  ;;  %v4780_v37 = vpop.f32.mrb[80].mxu0 }
 0x932   : > { %v4781_v41 = vpop.f32.mrb[81].mxu0 }
 0x933   : > { %v4782_v45 = vadd.f32 %v4781_v41, %v4780_v37  ;;  %v4783_v52 = vpop.f32.mrb[82].mxu0  ;;  %4940 = vmatpush3.bf16.msra.mxu0 %v4939_v44 }
 0x934   : > { %v4784_v54 = vpop.f32.mrb[83].mxu0  ;;  %4941 = vmatprep.subr.bf16.mxu0 %v5377_v49 }
 0x935   : > { %v4785_v58 = vadd.f32 %v4784_v54, %v4783_v52  ;;  %v4072_v59 = vmul.f32 %v4782_v45, %v4064_v53 }
 0x937   : > { %v4073_v60 = vmul.f32 %v4785_v58, %v4065_v55 }
 0x939   : > { %v4942_v19 = vpack.c.bf16 %v4073_v60, %v4072_v59  ;;  %v4786_v61 = vpop.f32.mrb[84].mxu0 }
 0x93a   : > { %v4787_v43 = vpop.f32.mrb[85].mxu0 }
 0x93b   : > { %v4788_v46 = vadd.f32 %v4787_v43, %v4786_v61  ;;  %v4789_v48 = vpop.f32.mrb[86].mxu0  ;;  %4943 = vmatpush3.bf16.msra.mxu0 %v4942_v19 }
 0x93c   : > { %v4790_v4 = vpop.f32.mrb[87].mxu0  ;;  %4944 = vmatprep.subr.bf16.mxu0 %v5377_v49 }
 0x93d   : > { %v4791_v6 = vadd.f32 %v4790_v4, %v4789_v48  ;;  %v4074_v7 = vmul.f32 %v4788_v46, %v4066_v50 }
 0x93f   : > { %v4075_v9 = vmul.f32 %v4791_v6, %v4067_v5 }
 0x941   : > { %v4945_v14 = vpack.c.bf16 %v4075_v9, %v4074_v7 }
 0x943   : > { %4946 = vmatpush3.bf16.msra.mxu0 %v4945_v14 }
 0x944   : > { %4947 = vmatprep.subr.bf16.mxu0 %v5377_v49 }
 0x946   : > { %4920 = vmatmul.mubr.msk.f32.vlgmr.msra.gmra.mrb[88].mxu0 %vm1948_vm1, %v4076_v17 }
 0x947   : > { %4949 = vmatpush3.bf16.msra.mxu0 %v4948_v47  ;;  %4932 = vmatprep.mubr.msk.f32.mxu0 %vm5378_vm4, %v5379_v34 }
 0x948   : > { %4950 = vmatprep.subr.bf16.mxu0 %v5377_v49 }
 0x94b   : > { %4952 = vmatpush3.bf16.msra.mxu0 %v4951_v51 }
 0x94c   : > { %4930 = vmatprep.subr.mxu0 %v5379_v34 }
 0x94f   : > { %4931 = vmatpush3.msra.mxu0 %v4154_v63 }
 0xa19   : > { %v4146_v18 = vpop.f32.mrb[88].mxu0 }
 0xa1a   : > { %v4921_v20 = vpop.f32.mrb[89].mxu0  ;;  %4933 = vmatmul.mubr.msk.f32.vlgmr.msra.gmra.mrb[90].mxu0 %vm4162_vm5, %v4146_v18 }
 0xaed   : > { %v4232_v21 = vpop.f32.mrb[90].mxu0 }
 0xaee   : > { %v4233_v22 = vadd.f32 %v4700_v25, %v4232_v21  ;;  %v4934_v23 = vpop.f32.mrb[91].mxu0 }
 0xaf0   : > { %4236 = vst [vmem:[%s521_s30] sm:$0xff] %v4233_v22 }
 0xaf1 PF: > { %s26_s21 = sadd.s32 1, %s5374_s21  }
 0xaf2   : > { %p23_p5 = scmp.ge.s32.totalorder %s26_s21, 4  }
 0xaf4   :  { %25 = sbr.rel (!%p23_p5) target bundleno = 2 (0x2), region = 127 }

</bundles_post_ra>
